<compile_context>
chip_gen: v5e
topology: v5e:2x2
jax: 0.10.0
libtpu: 0.0.40
codegen_flags: <defaults>
</compile_context>

<pallas_src>
import jax
import jax.numpy as jnp
import numpy as np
from jax import lax
from jax.experimental import pallas as pl
from jax.experimental.pallas import tpu as pltpu

BN_EPS = 1e-5
BN_GAMMA = 1.0     # weights_init: BatchNorm weight = 1.0
BN_BETA = 1e-4     # weights_init: BatchNorm bias   = 0.0001
STEP_K = 50        # only used by the training-mode step function (not implemented)


# ----------------------------- fused Pallas kernel -----------------------------

def _db_head_kernel(xc_ref, xt_ref, xb_ref, wc_ref, bc_ref, w1_ref, b1_ref,
                    w2_ref, b2_ref, o_ref, xp_ref, a_ref):
    # xc_ref : (1, TH, Wp, Cin)  centre rows of the W-padded NHWC input
    # xt_ref : (1, 1,  Wp, Cin)  row above the tile (clamped index; zeroed at r==0)
    # xb_ref : (1, 1,  Wp, Cin)  row below the tile (clamped index; zeroed at last r)
    # wc_ref : (9*Cin, 2*C4)     3x3 conv: taps on K, both branches on N, BN folded
    # w1_ref : (2*C4, 8*C4)      deconv1: 4 phases x 2 branches on N, BN folded
    # w2_ref : (8*C4, 32)        deconv2: (branch, rowphase, colphase) on N
    # o_ref  : (1, TH, W, 32)    32 fused output channels per input pixel
    # xp_ref : VMEM (TH+2, Wp, Cin)  halo-assembled tile
    # a_ref  : VMEM (TH*W, 9*Cin)    im2col matrix for the single conv matmul
    r = pl.program_id(1)
    th = xc_ref.shape[1]
    wp = xc_ref.shape[2]
    cin = xc_ref.shape[3]
    w = wp - 2

    # Assemble the row tile plus its 1-row halo (zero rows at image borders).
    top_valid = (r > 0).astype(jnp.float32)
    bot_valid = (r < pl.num_programs(1) - 1).astype(jnp.float32)
    xp_ref[0:1] = xt_ref[0] * top_valid
    xp_ref[1:th + 1] = xc_ref[0]
    xp_ref[th + 1:th + 2] = xb_ref[0] * bot_valid

    # im2col: tap t = 3*dy + dx occupies lanes [t*Cin, (t+1)*Cin).
    for dy in range(3):
        for dx in range(3):
            t = 3 * dy + dx
            tap = xp_ref[dy:dy + th, dx:dx + w, :]          # (TH, W, Cin)
            a_ref[:, t * cin:(t + 1) * cin] = tap.reshape(th * w, cin)

    # Stage 1: 3x3 conv (+ folded BN) + ReLU -- one K = 9*Cin MXU matmul.
    h1 = jnp.dot(a_ref[...], wc_ref[...], preferred_element_type=jnp.float32)
    h1 = jnp.maximum(h1 + bc_ref[...], 0.0)                 # (TH*W, 2*C4)

    # Stage 2: ConvT(2,2,s=2) (+ folded BN) + ReLU -- phases & branches on lanes.
    h2 = jnp.dot(h1, w1_ref[...], preferred_element_type=jnp.float32)
    h2 = jnp.maximum(h2 + b1_ref[...], 0.0)                 # (TH*W, 8*C4)

    # Stage 3: ConvT(2,2,s=2) + Sigmoid -- 4x4 sub-pixel phases x 2 branches.
    z = jnp.dot(h2, w2_ref[...], preferred_element_type=jnp.float32) + b2_ref[...]
    o = 1.0 / (1.0 + jnp.exp(-z))                           # (TH*W, 32)
    o_ref[0] = o.reshape(th, w, o.shape[-1])


def _db_head_pallas(xw, wc, bc, w1, b1, w2, b2, *, tile_h):
    n, h, wp, cin = xw.shape
    wd = wp - 2
    c2 = wc.shape[1]
    co = w2.shape[1]
    n_rt = h // tile_h

    return pl.pallas_call(
        _db_head_kernel,
        out_shape=jax.ShapeDtypeStruct((n, h, wd, co), jnp.float32),
        grid=(n, n_rt),
        in_specs=[
            pl.BlockSpec((1, tile_h, wp, cin), lambda i, r: (i, r, 0, 0)),
            pl.BlockSpec((1, 1, wp, cin),
                         lambda i, r: (i, jnp.maximum(r * tile_h - 1, 0), 0, 0)),
            pl.BlockSpec((1, 1, wp, cin),
                         lambda i, r: (i, jnp.minimum((r + 1) * tile_h, h - 1), 0, 0)),
            pl.BlockSpec((9 * cin, c2), lambda i, r: (0, 0)),
            pl.BlockSpec((1, c2), lambda i, r: (0, 0)),
            pl.BlockSpec((c2, 4 * c2), lambda i, r: (0, 0)),
            pl.BlockSpec((1, 4 * c2), lambda i, r: (0, 0)),
            pl.BlockSpec((4 * c2, co), lambda i, r: (0, 0)),
            pl.BlockSpec((1, co), lambda i, r: (0, 0)),
        ],
        out_specs=pl.BlockSpec((1, tile_h, wd, co), lambda i, r: (i, r, 0, 0)),
        scratch_shapes=[
            pltpu.VMEM((tile_h + 2, wp, cin), jnp.float32),
            pltpu.VMEM((tile_h * wd, 9 * cin), jnp.float32),
        ],
        compiler_params=pltpu.CompilerParams(
            dimension_semantics=("parallel", "parallel"),
            vmem_limit_bytes=32 * 1024 * 1024),
    )(xw, xw, xw, wc, bc, w1, b1, w2, b2)


# ----------------------------- wrapper-side weight fusion -----------------------------

def _block_diag(a, b):
    za = jnp.zeros((a.shape[0], b.shape[1]), jnp.float32)
    zb = jnp.zeros((b.shape[0], a.shape[1]), jnp.float32)
    return jnp.concatenate(
        [jnp.concatenate([a, za], axis=1), jnp.concatenate([zb, b], axis=1)], axis=0)


def fuse_params(p):
    """Fold BN (running stats mean=0, var=1) and fuse taps / phases / branches."""
    s = BN_GAMMA / np.sqrt(1.0 + BN_EPS)
    c4, cin = p["b_conv_w"].shape[0], p["b_conv_w"].shape[1]

    # 3x3 conv: (C4, Cin, 3, 3) -> (9*Cin, C4), row = (3*ky+kx)*Cin + c, BN folded.
    def conv_prep(w):
        return (s * jnp.transpose(w, (2, 3, 1, 0))).reshape(9 * cin, c4)

    wc = jnp.concatenate([conv_prep(p["b_conv_w"]), conv_prep(p["t_conv_w"])], axis=1)
    bc = jnp.concatenate([s * p["b_conv_b"] + BN_BETA,
                          jnp.full((c4,), BN_BETA, jnp.float32)])  # thresh conv: no bias

    # deconv1: columns ordered (phase d1, branch, out-channel), block-diag over branch.
    blocks = []
    for d1y in range(2):
        for d1x in range(2):
            blocks.append(_block_diag(s * p["b_dc1_w"][:, :, d1y, d1x],
                                      s * p["t_dc1_w"][:, :, d1y, d1x]))
    w1 = jnp.concatenate(blocks, axis=1)                                # (2C4, 8C4)
    b1 = jnp.tile(jnp.concatenate([s * p["b_dc1_b"] + BN_BETA,
                                   s * p["t_dc1_b"] + BN_BETA]), 4)     # (8C4,)

    # deconv2: rows = (d1, branch, c); columns = (branch, rowphase rp, colphase cp).
    w2 = jnp.zeros((8 * c4, 32), jnp.float32)
    for bi, w2x in ((0, p["b_dc2_w"]), (1, p["t_dc2_w"])):
        for d1y in range(2):
            for d1x in range(2):
                r0 = (2 * d1y + d1x) * 2 * c4 + bi * c4
                for d2y in range(2):
                    for d2x in range(2):
                        col = bi * 16 + 4 * (2 * d1y + d2y) + (2 * d1x + d2x)
                        w2 = w2.at[r0:r0 + c4, col].set(w2x[:, 0, d2y, d2x])
    b2 = jnp.concatenate([jnp.full((16,), p["b_dc2_b"][0], jnp.float32),
                          jnp.full((16,), p["t_dc2_b"][0], jnp.float32)])

    return (wc, bc.reshape(1, 2 * c4), w1, b1.reshape(1, 8 * c4),
            w2, b2.reshape(1, 32))


def db_head_forward(x_nchw, p, *, tile_h=8):
    n, _, h, wd = x_nchw.shape
    th = tile_h if (h % tile_h == 0) else h
    fused = fuse_params(p)

    # NHWC, W padded by 1 on each side (H halo is fetched via the extra row inputs).
    xw = jnp.pad(jnp.transpose(x_nchw, (0, 2, 3, 1)),
                 ((0, 0), (0, 0), (1, 1), (0, 0)))

    out = _db_head_pallas(xw, *fused, tile_h=th)            # (N, H, W, 32)

    # Sub-pixel interleave: channel = b*16 + rp*4 + cp -> pixel (b, 4*i+rp, 4*j+cp).
    y = out.reshape(n, h, wd, 2, 4, 4)
    y = jnp.transpose(y, (0, 3, 1, 4, 2, 5))
    # TODO(synk): training-mode path (batch-stats BatchNorm + step_function binary
    # map) not implemented; this matches model.eval() forward.
    return y.reshape(n, 2, 4 * h, 4 * wd)


# ----------------------------- pure-JAX reference -----------------------------

def _ref_branch(x_nhwc, conv_w, conv_b, dc1_w, dc1_b, dc2_w, dc2_b):
    dn = ("NHWC", "HWIO", "NHWC")
    prec = lax.Precision.HIGHEST

    def bn(y):
        return BN_GAMMA * y / jnp.sqrt(1.0 + BN_EPS) + BN_BETA

    w = jnp.transpose(conv_w, (2, 3, 1, 0))
    y = lax.conv_general_dilated(x_nhwc, w, (1, 1), ((1, 1), (1, 1)),
                                 dimension_numbers=dn, precision=prec) + conv_b
    y = jnp.maximum(bn(y), 0.0)

    def deconv(z, wt, b):
        wf = jnp.transpose(wt, (2, 3, 0, 1))[::-1, ::-1]  # flip spatially, HWIO
        o = lax.conv_general_dilated(z, wf, (1, 1), ((1, 1), (1, 1)),
                                     lhs_dilation=(2, 2),
                                     dimension_numbers=dn, precision=prec)
        return o + b

    y = jnp.maximum(bn(deconv(y, dc1_w, dc1_b)), 0.0)
    return jax.nn.sigmoid(deconv(y, dc2_w, dc2_b))


def ref_forward(x_nchw, p):
    x = jnp.transpose(x_nchw, (0, 2, 3, 1))
    zeros_c4 = jnp.zeros((p["t_conv_w"].shape[0],), jnp.float32)
    shrink = _ref_branch(x, p["b_conv_w"], p["b_conv_b"], p["b_dc1_w"], p["b_dc1_b"],
                         p["b_dc2_w"], p["b_dc2_b"])
    thresh = _ref_branch(x, p["t_conv_w"], zeros_c4, p["t_dc1_w"], p["t_dc1_b"],
                         p["t_dc2_w"], p["t_dc2_b"])
    y = jnp.concatenate([shrink, thresh], axis=-1)
    return jnp.transpose(y, (0, 3, 1, 2))


# ----------------------------- deterministic parameters -----------------------------

def init_params(key, cin):
    c4 = cin // 4
    ks = jax.random.split(key, 11)

    def kaiming(k, shape, fan_in):
        return jax.random.normal(k, shape, jnp.float32) * jnp.sqrt(2.0 / fan_in)

    p = {}
    # binarize branch (conv bias=True, both deconvs bias=True)
    p["b_conv_w"] = kaiming(ks[0], (c4, cin, 3, 3), cin * 9)
    p["b_conv_b"] = 0.01 * jax.random.normal(ks[1], (c4,), jnp.float32)
    p["b_dc1_w"] = kaiming(ks[2], (c4, c4, 2, 2), c4 * 4)
    p["b_dc1_b"] = 0.01 * jax.random.normal(ks[3], (c4,), jnp.float32)
    p["b_dc2_w"] = kaiming(ks[4], (c4, 1, 2, 2), c4 * 4)
    p["b_dc2_b"] = 0.01 * jax.random.normal(ks[5], (1,), jnp.float32)
    # thresh branch (first conv bias=False, deconvs bias=True)
    p["t_conv_w"] = kaiming(ks[6], (c4, cin, 3, 3), cin * 9)
    p["t_dc1_w"] = kaiming(ks[7], (c4, c4, 2, 2), c4 * 4)
    p["t_dc1_b"] = 0.01 * jax.random.normal(ks[8], (c4,), jnp.float32)
    p["t_dc2_w"] = kaiming(ks[9], (c4, 1, 2, 2), c4 * 4)
    p["t_dc2_b"] = 0.01 * jax.random.normal(ks[10], (1,), jnp.float32)
    return p


# ----------------------------- main -----------------------------

if __name__ == "__main__":
    key = jax.random.PRNGKey(0)
    in_channels = 128          # keeps Cin a lane multiple; C4 = 32
    N, H, W = 2, 16, 16

    k_x, k_p = jax.random.split(key)
    x = jax.random.normal(k_x, (N, in_channels, H, W), jnp.float32)
    params = init_params(k_p, in_channels)

    out = jax.jit(lambda xx: db_head_forward(xx, params))(x)
    out = jax.block_until_ready(out)

    assert out.shape == (N, 2, 4 * H, 4 * W), out.shape
    ref = ref_forward(x, params)
    np.testing.assert_allclose(np.asarray(out), np.asarray(ref), rtol=5e-3, atol=2e-3)

    print("KERNEL_OK")
</pallas_src>

<mosaic_0001>
module attributes {stable_mosaic.version = 11 : i64} {
  func.func @_db_head_kernel(%arg0: i32, %arg1: i32, %arg2: memref<1x8x18x128xf32, #tpu.memory_space<vmem>>, %arg3: memref<1x1x18x128xf32, #tpu.memory_space<vmem>>, %arg4: memref<1x1x18x128xf32, #tpu.memory_space<vmem>>, %arg5: memref<1152x64xf32, #tpu.memory_space<vmem>>, %arg6: memref<1x64xf32, #tpu.memory_space<vmem>>, %arg7: memref<64x256xf32, #tpu.memory_space<vmem>>, %arg8: memref<1x256xf32, #tpu.memory_space<vmem>>, %arg9: memref<256x32xf32, #tpu.memory_space<vmem>>, %arg10: memref<1x32xf32, #tpu.memory_space<vmem>>, %arg11: memref<1x8x16x32xf32, #tpu.memory_space<vmem>>, %arg12: memref<10x18x128xf32, #tpu.memory_space<vmem>>, %arg13: memref<128x1152xf32, #tpu.memory_space<vmem>>) attributes {dimension_semantics = [#tpu.dimension_semantics<parallel>, #tpu.dimension_semantics<parallel>], iteration_bounds = array<i64: 2, 2>, scalar_prefetch = 0 : i64, scratch_operands = 2 : i64, tpu.core_type = #tpu.core_type<tc>, window_params = [{transform_indices = @transform_0, window_bounds = array<i64: 1, 8, 18, 128>}, {transform_indices = @transform_1, window_bounds = array<i64: 1, 1, 18, 128>}, {transform_indices = @transform_2, window_bounds = array<i64: 1, 1, 18, 128>}, {pipeline_mode = #tpu.pipeline_mode<synchronous>, transform_indices = @transform_3, window_bounds = array<i64: 1152, 64>}, {pipeline_mode = #tpu.pipeline_mode<synchronous>, transform_indices = @transform_4, window_bounds = array<i64: 1, 64>}, {pipeline_mode = #tpu.pipeline_mode<synchronous>, transform_indices = @transform_5, window_bounds = array<i64: 64, 256>}, {pipeline_mode = #tpu.pipeline_mode<synchronous>, transform_indices = @transform_6, window_bounds = array<i64: 1, 256>}, {pipeline_mode = #tpu.pipeline_mode<synchronous>, transform_indices = @transform_7, window_bounds = array<i64: 256, 32>}, {pipeline_mode = #tpu.pipeline_mode<synchronous>, transform_indices = @transform_8, window_bounds = array<i64: 1, 32>}, {transform_indices = @transform_9, window_bounds = array<i64: 1, 8, 16, 32>}]} {
    %c0_i32 = arith.constant 0 : i32
    %0 = arith.cmpi sgt, %arg1, %c0_i32 : i32
    %1 = arith.extui %0 : i1 to i32
    %2 = arith.sitofp %1 : i32 to f32
    %c1_i32 = arith.constant 1 : i32
    %3 = arith.cmpi slt, %arg1, %c1_i32 : i32
    %4 = arith.extui %3 : i1 to i32
    %5 = arith.sitofp %4 : i32 to f32
    %c0 = arith.constant 0 : index
    %c0_0 = arith.constant 0 : index
    %c0_1 = arith.constant 0 : index
    %c0_2 = arith.constant 0 : index
    %6 = vector.load %arg3[%c0, %c0_0, %c0_1, %c0_2] : memref<1x1x18x128xf32, #tpu.memory_space<vmem>>, vector<1x1x18x128xf32>
    %7 = vector.shape_cast %6 : vector<1x1x18x128xf32> to vector<1x18x128xf32>
    %8 = vector.broadcast %2 : f32 to vector<1x18x128xf32>
    %9 = arith.mulf %7, %8 : vector<1x18x128xf32>
    %c0_3 = arith.constant 0 : index
    %c0_4 = arith.constant 0 : index
    %c0_5 = arith.constant 0 : index
    %10 = vector.load %arg12[%c0_3, %c0_4, %c0_5] : memref<10x18x128xf32, #tpu.memory_space<vmem>>, vector<1x18x128xf32>
    tpu.vector_store %arg12[%c0_3, %c0_4, %c0_5], %9 {strides = array<i32>} : memref<10x18x128xf32, #tpu.memory_space<vmem>>, vector<1x18x128xf32>,
    %c0_6 = arith.constant 0 : index
    %c0_7 = arith.constant 0 : index
    %c0_8 = arith.constant 0 : index
    %c0_9 = arith.constant 0 : index
    %11 = vector.load %arg2[%c0_6, %c0_7, %c0_8, %c0_9] : memref<1x8x18x128xf32, #tpu.memory_space<vmem>>, vector<1x8x18x128xf32>
    %12 = vector.shape_cast %11 : vector<1x8x18x128xf32> to vector<8x18x128xf32>
    %c1 = arith.constant 1 : index
    %c0_10 = arith.constant 0 : index
    %c0_11 = arith.constant 0 : index
    %13 = vector.load %arg12[%c1, %c0_10, %c0_11] : memref<10x18x128xf32, #tpu.memory_space<vmem>>, vector<8x18x128xf32>
    tpu.vector_store %arg12[%c1, %c0_10, %c0_11], %12 {strides = array<i32>} : memref<10x18x128xf32, #tpu.memory_space<vmem>>, vector<8x18x128xf32>,
    %c0_12 = arith.constant 0 : index
    %c0_13 = arith.constant 0 : index
    %c0_14 = arith.constant 0 : index
    %c0_15 = arith.constant 0 : index
    %14 = vector.load %arg4[%c0_12, %c0_13, %c0_14, %c0_15] : memref<1x1x18x128xf32, #tpu.memory_space<vmem>>, vector<1x1x18x128xf32>
    %15 = vector.shape_cast %14 : vector<1x1x18x128xf32> to vector<1x18x128xf32>
    %16 = vector.broadcast %5 : f32 to vector<1x18x128xf32>
    %17 = arith.mulf %15, %16 : vector<1x18x128xf32>
    %c9 = arith.constant 9 : index
    %c0_16 = arith.constant 0 : index
    %c0_17 = arith.constant 0 : index
    %18 = vector.load %arg12[%c9, %c0_16, %c0_17] : memref<10x18x128xf32, #tpu.memory_space<vmem>>, vector<1x18x128xf32>
    tpu.vector_store %arg12[%c9, %c0_16, %c0_17], %17 {strides = array<i32>} : memref<10x18x128xf32, #tpu.memory_space<vmem>>, vector<1x18x128xf32>,
    %c0_18 = arith.constant 0 : index
    %c0_19 = arith.constant 0 : index
    %c0_20 = arith.constant 0 : index
    %19 = vector.load %arg12[%c0_18, %c0_19, %c0_20] : memref<10x18x128xf32, #tpu.memory_space<vmem>>, vector<8x16x128xf32>
    %20 = vector.shape_cast %19 : vector<8x16x128xf32> to vector<128x128xf32>
    %c0_21 = arith.constant 0 : index
    %c0_22 = arith.constant 0 : index
    %21 = vector.load %arg13[%c0_21, %c0_22] : memref<128x1152xf32, #tpu.memory_space<vmem>>, vector<128x128xf32>
    tpu.vector_store %arg13[%c0_21, %c0_22], %20 {strides = array<i32>} : memref<128x1152xf32, #tpu.memory_space<vmem>>, vector<128x128xf32>,
    %c0_23 = arith.constant 0 : index
    %c1_24 = arith.constant 1 : index
    %c0_25 = arith.constant 0 : index
    %22 = vector.load %arg12[%c0_23, %c1_24, %c0_25] : memref<10x18x128xf32, #tpu.memory_space<vmem>>, vector<8x16x128xf32>
    %23 = vector.shape_cast %22 : vector<8x16x128xf32> to vector<128x128xf32>
    %c0_26 = arith.constant 0 : index
    %c128 = arith.constant 128 : index
    %24 = vector.load %arg13[%c0_26, %c128] : memref<128x1152xf32, #tpu.memory_space<vmem>>, vector<128x128xf32>
    tpu.vector_store %arg13[%c0_26, %c128], %23 {strides = array<i32>} : memref<128x1152xf32, #tpu.memory_space<vmem>>, vector<128x128xf32>,
    %c0_27 = arith.constant 0 : index
    %c2 = arith.constant 2 : index
    %c0_28 = arith.constant 0 : index
    %25 = vector.load %arg12[%c0_27, %c2, %c0_28] : memref<10x18x128xf32, #tpu.memory_space<vmem>>, vector<8x16x128xf32>
    %26 = vector.shape_cast %25 : vector<8x16x128xf32> to vector<128x128xf32>
    %c0_29 = arith.constant 0 : index
    %c256 = arith.constant 256 : index
    %27 = vector.load %arg13[%c0_29, %c256] : memref<128x1152xf32, #tpu.memory_space<vmem>>, vector<128x128xf32>
    tpu.vector_store %arg13[%c0_29, %c256], %26 {strides = array<i32>} : memref<128x1152xf32, #tpu.memory_space<vmem>>, vector<128x128xf32>,
    %c1_30 = arith.constant 1 : index
    %c0_31 = arith.constant 0 : index
    %c0_32 = arith.constant 0 : index
    %28 = vector.load %arg12[%c1_30, %c0_31, %c0_32] : memref<10x18x128xf32, #tpu.memory_space<vmem>>, vector<8x16x128xf32>
    %29 = vector.shape_cast %28 : vector<8x16x128xf32> to vector<128x128xf32>
    %c0_33 = arith.constant 0 : index
    %c384 = arith.constant 384 : index
    %30 = vector.load %arg13[%c0_33, %c384] : memref<128x1152xf32, #tpu.memory_space<vmem>>, vector<128x128xf32>
    tpu.vector_store %arg13[%c0_33, %c384], %29 {strides = array<i32>} : memref<128x1152xf32, #tpu.memory_space<vmem>>, vector<128x128xf32>,
    %c1_34 = arith.constant 1 : index
    %c1_35 = arith.constant 1 : index
    %c0_36 = arith.constant 0 : index
    %31 = vector.load %arg12[%c1_34, %c1_35, %c0_36] : memref<10x18x128xf32, #tpu.memory_space<vmem>>, vector<8x16x128xf32>
    %32 = vector.shape_cast %31 : vector<8x16x128xf32> to vector<128x128xf32>
    %c0_37 = arith.constant 0 : index
    %c512 = arith.constant 512 : index
    %33 = vector.load %arg13[%c0_37, %c512] : memref<128x1152xf32, #tpu.memory_space<vmem>>, vector<128x128xf32>
    tpu.vector_store %arg13[%c0_37, %c512], %32 {strides = array<i32>} : memref<128x1152xf32, #tpu.memory_space<vmem>>, vector<128x128xf32>,
    %c1_38 = arith.constant 1 : index
    %c2_39 = arith.constant 2 : index
    %c0_40 = arith.constant 0 : index
    %34 = vector.load %arg12[%c1_38, %c2_39, %c0_40] : memref<10x18x128xf32, #tpu.memory_space<vmem>>, vector<8x16x128xf32>
    %35 = vector.shape_cast %34 : vector<8x16x128xf32> to vector<128x128xf32>
    %c0_41 = arith.constant 0 : index
    %c640 = arith.constant 640 : index
    %36 = vector.load %arg13[%c0_41, %c640] : memref<128x1152xf32, #tpu.memory_space<vmem>>, vector<128x128xf32>
    tpu.vector_store %arg13[%c0_41, %c640], %35 {strides = array<i32>} : memref<128x1152xf32, #tpu.memory_space<vmem>>, vector<128x128xf32>,
    %c2_42 = arith.constant 2 : index
    %c0_43 = arith.constant 0 : index
    %c0_44 = arith.constant 0 : index
    %37 = vector.load %arg12[%c2_42, %c0_43, %c0_44] : memref<10x18x128xf32, #tpu.memory_space<vmem>>, vector<8x16x128xf32>
    %38 = vector.shape_cast %37 : vector<8x16x128xf32> to vector<128x128xf32>
    %c0_45 = arith.constant 0 : index
    %c768 = arith.constant 768 : index
    %39 = vector.load %arg13[%c0_45, %c768] : memref<128x1152xf32, #tpu.memory_space<vmem>>, vector<128x128xf32>
    tpu.vector_store %arg13[%c0_45, %c768], %38 {strides = array<i32>} : memref<128x1152xf32, #tpu.memory_space<vmem>>, vector<128x128xf32>,
    %c2_46 = arith.constant 2 : index
    %c1_47 = arith.constant 1 : index
    %c0_48 = arith.constant 0 : index
    %40 = vector.load %arg12[%c2_46, %c1_47, %c0_48] : memref<10x18x128xf32, #tpu.memory_space<vmem>>, vector<8x16x128xf32>
    %41 = vector.shape_cast %40 : vector<8x16x128xf32> to vector<128x128xf32>
    %c0_49 = arith.constant 0 : index
    %c896 = arith.constant 896 : index
    %42 = vector.load %arg13[%c0_49, %c896] : memref<128x1152xf32, #tpu.memory_space<vmem>>, vector<128x128xf32>
    tpu.vector_store %arg13[%c0_49, %c896], %41 {strides = array<i32>} : memref<128x1152xf32, #tpu.memory_space<vmem>>, vector<128x128xf32>,
    %c2_50 = arith.constant 2 : index
    %c2_51 = arith.constant 2 : index
    %c0_52 = arith.constant 0 : index
    %43 = vector.load %arg12[%c2_50, %c2_51, %c0_52] : memref<10x18x128xf32, #tpu.memory_space<vmem>>, vector<8x16x128xf32>
    %44 = vector.shape_cast %43 : vector<8x16x128xf32> to vector<128x128xf32>
    %c0_53 = arith.constant 0 : index
    %c1024 = arith.constant 1024 : index
    %45 = vector.load %arg13[%c0_53, %c1024] : memref<128x1152xf32, #tpu.memory_space<vmem>>, vector<128x128xf32>
    tpu.vector_store %arg13[%c0_53, %c1024], %44 {strides = array<i32>} : memref<128x1152xf32, #tpu.memory_space<vmem>>, vector<128x128xf32>,
    %c0_54 = arith.constant 0 : index
    %c0_55 = arith.constant 0 : index
    %46 = vector.load %arg13[%c0_54, %c0_55] : memref<128x1152xf32, #tpu.memory_space<vmem>>, vector<128x1152xf32>
    %c0_56 = arith.constant 0 : index
    %c0_57 = arith.constant 0 : index
    %47 = vector.load %arg5[%c0_56, %c0_57] : memref<1152x64xf32, #tpu.memory_space<vmem>>, vector<1152x64xf32>
    %cst = arith.constant dense<0.000000e+00> : vector<128x64xf32>
    %48 = tpu.matmul %46, %47, %cst {dimension_numbers = #tpu.dot_dimension_numbers<[1], [0], [0], [1], [0, 0, 1, 1], [], []>} : vector<128x1152xf32>, vector<1152x64xf32>, vector<128x64xf32> -> vector<128x64xf32>
    %c0_58 = arith.constant 0 : index
    %c0_59 = arith.constant 0 : index
    %49 = vector.load %arg6[%c0_58, %c0_59] : memref<1x64xf32, #tpu.memory_space<vmem>>, vector<1x64xf32>
    %50 = vector.broadcast %49 : vector<1x64xf32> to vector<128x64xf32>
    %51 = arith.addf %48, %50 : vector<128x64xf32>
    %cst_60 = arith.constant 0.000000e+00 : f32
    %52 = vector.broadcast %cst_60 : f32 to vector<128x64xf32>
    %53 = arith.maximumf %51, %52 : vector<128x64xf32>
    %c0_61 = arith.constant 0 : index
    %c0_62 = arith.constant 0 : index
    %54 = vector.load %arg7[%c0_61, %c0_62] : memref<64x256xf32, #tpu.memory_space<vmem>>, vector<64x256xf32>
    %cst_63 = arith.constant dense<0.000000e+00> : vector<128x256xf32>
    %55 = tpu.matmul %53, %54, %cst_63 {dimension_numbers = #tpu.dot_dimension_numbers<[1], [0], [0], [1], [0, 0, 1, 1], [], []>} : vector<128x64xf32>, vector<64x256xf32>, vector<128x256xf32> -> vector<128x256xf32>
    %c0_64 = arith.constant 0 : index
    %c0_65 = arith.constant 0 : index
    %56 = vector.load %arg8[%c0_64, %c0_65] : memref<1x256xf32, #tpu.memory_space<vmem>>, vector<1x256xf32>
    %57 = vector.broadcast %56 : vector<1x256xf32> to vector<128x256xf32>
    %58 = arith.addf %55, %57 : vector<128x256xf32>
    %cst_66 = arith.constant 0.000000e+00 : f32
    %59 = vector.broadcast %cst_66 : f32 to vector<128x256xf32>
    %60 = arith.maximumf %58, %59 : vector<128x256xf32>
    %c0_67 = arith.constant 0 : index
    %c0_68 = arith.constant 0 : index
    %61 = vector.load %arg9[%c0_67, %c0_68] : memref<256x32xf32, #tpu.memory_space<vmem>>, vector<256x32xf32>
    %cst_69 = arith.constant dense<0.000000e+00> : vector<128x32xf32>
    %62 = tpu.matmul %60, %61, %cst_69 {dimension_numbers = #tpu.dot_dimension_numbers<[1], [0], [0], [1], [0, 0, 1, 1], [], []>} : vector<128x256xf32>, vector<256x32xf32>, vector<128x32xf32> -> vector<128x32xf32>
    %c0_70 = arith.constant 0 : index
    %c0_71 = arith.constant 0 : index
    %63 = vector.load %arg10[%c0_70, %c0_71] : memref<1x32xf32, #tpu.memory_space<vmem>>, vector<1x32xf32>
    %64 = vector.broadcast %63 : vector<1x32xf32> to vector<128x32xf32>
    %65 = arith.addf %62, %64 : vector<128x32xf32>
    %cst_72 = arith.constant 0.000000e+00 : f32
    %66 = vector.broadcast %cst_72 : f32 to vector<128x32xf32>
    %67 = arith.subf %66, %65 : vector<128x32xf32>
    %68 = math.exp %67 : vector<128x32xf32>
    %cst_73 = arith.constant 1.000000e+00 : f32
    %69 = vector.broadcast %cst_73 : f32 to vector<128x32xf32>
    %70 = arith.addf %69, %68 : vector<128x32xf32>
    %cst_74 = arith.constant 1.000000e+00 : f32
    %71 = vector.broadcast %cst_74 : f32 to vector<128x32xf32>
    %72 = arith.divf %71, %70 : vector<128x32xf32>
    %73 = vector.shape_cast %72 : vector<128x32xf32> to vector<8x16x32xf32>
    %c0_75 = arith.constant 0 : index
    %c0_76 = arith.constant 0 : index
    %c0_77 = arith.constant 0 : index
    %c0_78 = arith.constant 0 : index
    %74 = vector.load %arg11[%c0_75, %c0_76, %c0_77, %c0_78] : memref<1x8x16x32xf32, #tpu.memory_space<vmem>>, vector<1x8x16x32xf32>
    %75 = vector.shape_cast %74 : vector<1x8x16x32xf32> to vector<8x16x32xf32>
    %76 = vector.shape_cast %73 : vector<8x16x32xf32> to vector<1x8x16x32xf32>
    tpu.vector_store %arg11[%c0_75, %c0_76, %c0_77, %c0_78], %76 {strides = array<i32>} : memref<1x8x16x32xf32, #tpu.memory_space<vmem>>, vector<1x8x16x32xf32>,
    return
  }
  func.func @transform_0(%arg0: i32, %arg1: i32) -> (i32, i32, i32, i32) {
    %c0_i32 = arith.constant 0 : i32
    %c0_i32_0 = arith.constant 0 : i32
    %c0_i32_1 = arith.constant 0 : i32
    return %arg0, %arg1, %c0_i32, %c0_i32_0 : i32, i32, i32, i32
  }
  func.func @transform_1(%arg0: i32, %arg1: i32) -> (i32, i32, i32, i32) {
    %c8_i32 = arith.constant 8 : i32
    %0 = arith.muli %arg1, %c8_i32 : i32
    %c1_i32 = arith.constant 1 : i32
    %1 = arith.subi %0, %c1_i32 : i32
    %c0_i32 = arith.constant 0 : i32
    %2 = arith.maxsi %1, %c0_i32 : i32
    %c0_i32_0 = arith.constant 0 : i32
    %c0_i32_1 = arith.constant 0 : i32
    %c0_i32_2 = arith.constant 0 : i32
    return %arg0, %2, %c0_i32_0, %c0_i32_1 : i32, i32, i32, i32
  }
  func.func @transform_2(%arg0: i32, %arg1: i32) -> (i32, i32, i32, i32) {
    %c1_i32 = arith.constant 1 : i32
    %0 = arith.addi %arg1, %c1_i32 : i32
    %c8_i32 = arith.constant 8 : i32
    %1 = arith.muli %0, %c8_i32 : i32
    %c15_i32 = arith.constant 15 : i32
    %2 = arith.minsi %1, %c15_i32 : i32
    %c0_i32 = arith.constant 0 : i32
    %c0_i32_0 = arith.constant 0 : i32
    %c0_i32_1 = arith.constant 0 : i32
    return %arg0, %2, %c0_i32, %c0_i32_0 : i32, i32, i32, i32
  }
  func.func @transform_3(%arg0: i32, %arg1: i32) -> (i32, i32) {
    %c0_i32 = arith.constant 0 : i32
    %c0_i32_0 = arith.constant 0 : i32
    %c0_i32_1 = arith.constant 0 : i32
    return %c0_i32, %c0_i32_0 : i32, i32
  }
  func.func @transform_4(%arg0: i32, %arg1: i32) -> (i32, i32) {
    %c0_i32 = arith.constant 0 : i32
    %c0_i32_0 = arith.constant 0 : i32
    %c0_i32_1 = arith.constant 0 : i32
    return %c0_i32, %c0_i32_0 : i32, i32
  }
  func.func @transform_5(%arg0: i32, %arg1: i32) -> (i32, i32) {
    %c0_i32 = arith.constant 0 : i32
    %c0_i32_0 = arith.constant 0 : i32
    %c0_i32_1 = arith.constant 0 : i32
    return %c0_i32, %c0_i32_0 : i32, i32
  }
  func.func @transform_6(%arg0: i32, %arg1: i32) -> (i32, i32) {
    %c0_i32 = arith.constant 0 : i32
    %c0_i32_0 = arith.constant 0 : i32
    %c0_i32_1 = arith.constant 0 : i32
    return %c0_i32, %c0_i32_0 : i32, i32
  }
  func.func @transform_7(%arg0: i32, %arg1: i32) -> (i32, i32) {
    %c0_i32 = arith.constant 0 : i32
    %c0_i32_0 = arith.constant 0 : i32
    %c0_i32_1 = arith.constant 0 : i32
    return %c0_i32, %c0_i32_0 : i32, i32
  }
  func.func @transform_8(%arg0: i32, %arg1: i32) -> (i32, i32) {
    %c0_i32 = arith.constant 0 : i32
    %c0_i32_0 = arith.constant 0 : i32
    %c0_i32_1 = arith.constant 0 : i32
    return %c0_i32, %c0_i32_0 : i32, i32
  }
  func.func @transform_9(%arg0: i32, %arg1: i32) -> (i32, i32, i32, i32) {
    %c0_i32 = arith.constant 0 : i32
    %c0_i32_0 = arith.constant 0 : i32
    %c0_i32_1 = arith.constant 0 : i32
    return %arg0, %arg1, %c0_i32, %c0_i32_0 : i32, i32, i32, i32
  }
}

</mosaic_0001>

<bundles_post_ra>
// kernel: tile.6
= control target key start
LH: loop header
LB: loop body
LE: loop exit
PB: predicated region body
PF: predicated region fallthrough
CT: control target
= control target key end

     0   :  { %2 = vsyncpa [#allocation1], 0  ;;  %s48_s8 = smov [#allocation0]   ;;  %s65_s0 = inlined_call_operand.hbm [shape: f32[64], index: 0, kind: input, shape index: {}]   ;;  %s66_s1 = inlined_call_operand.vmem [shape: f32[4,64], index: 1, kind: output, shape index: {}]  }
   0x1   :  { %s8_s0 = sshll.u32 %s65_s0, 4  ;;  %s10_s9 = sshll.u32 %s48_s8, 4  ;;  %s9_s0 = int_to_ptr.hbm [resolvable:$true] %s8_s0  ;;  %s11_s9 = int_to_ptr.vmem [resolvable:$true] %s10_s9 }
   0x2   :  { %13 = dma.hbm_to_vmem [thread:$0]  %s9_s0, 16, %s11_s9, [#allocation1]  }
   0x3   :  { %46 = dma.done.wait [#allocation1], 16  }
   0x4   :  { %47 = vsyncadd [#allocation1], 4294967280  ;;  %v18_v0 = vld [vmem:[#allocation0] ss:$0 sm:$0xff] }
   0x5   :  { %19 = vst [vmem:[%s66_s1] sm:$0xf] %v18_v0 }
   0x6   :  { %20 = vsyncpa [#allocation1], 1 }

// kernel: tile.7
= control target key start
LH: loop header
LB: loop body
LE: loop exit
PB: predicated region body
PF: predicated region fallthrough
CT: control target
= control target key end

     0   :  { %s6_s8 = smov 3  ;;  %vm8_vm0 = vcmask 523264   ;;  %s31_s9 = smov 64   ;;  %vm15_vm1 = vcmask 1048064   ;;  %s51_s0 = inlined_call_operand.vmem [shape: f32[4,64], index: 0, kind: input, shape index: {}]   ;;  %s52_s1 = inlined_call_operand.vmem [shape: f32[1,256], index: 1, kind: output, shape index: {}]  }
   0x1   :  { %v4_v0 = vld [vmem:[%s51_s0] sm:$0xf]  ;;  %s11_s0 = smov 3 }
   0x2   :  { %5 = vst [vmem:[#allocation1] sm:$0xf] %v4_v0 }
   0x9   :  { %v12_v1 = vld [vmem:[#allocation1 + $0x1] ss:$2 sm:%s11_s0]   ;;  %v7_v2 = vld [vmem:[#allocation1] ss:$2 sm:%s6_s8]  }
   0xa   :  { %13 = vrot.lane.b32.xlu0 %v12_v1, %s31_s9  ;;  %9 = vst.msk [vmem:[#allocation0] ss:$8 sm:$0x3] %vm8_vm0, %v7_v2  }
  0x7c   :  { %v14_v3 = vpop.permute.xlu0 %13  }
  0x7d   :  { %16 = vst.msk [vmem:[#allocation0] ss:$8 sm:$0x3] %vm15_vm1, %v14_v3  }
  0x84   :  { %v19_v4 = vld [vmem:[#allocation0] sm:$0x1]  ;;  %v24_v5 = vld [vmem:[#allocation0 + $0x8] sm:$0x1] }
  0x85   :  { %22 = vst [vmem:[%s52_s1] sm:$0x1] %v19_v4 }
  0x86   :  { %29 = vst [vmem:[%s52_s1 + $0x1] sm:$0x1] %v24_v5 }

// kernel: _lambda_.1
= control target key start
LH: loop header
LB: loop body
LE: loop exit
PB: predicated region body
PF: predicated region fallthrough
CT: control target
= control target key end

     0   :  { %s4069_s0 = inlined_call_operand.vmem [shape: f32[2,16,18,128], index: 0, kind: input, shape index: {}, may-alias: {0,1,2}]   ;;  %s4070_s1 = inlined_call_operand.vmem [shape: f32[2,16,18,128], index: 1, kind: input, shape index: {}, may-alias: {0,1,2}]   ;;  %s4071_s2 = inlined_call_operand.vmem [shape: f32[2,16,18,128], index: 2, kind: input, shape index: {}, may-alias: {0,1,2}]   ;;  %s4072_s3 = inlined_call_operand.hbm [shape: f32[1152,64], index: 3, kind: input, shape index: {}]   ;;  %s4073_s4 = inlined_call_operand.hbm [shape: f32[1,64], index: 4, kind: input, shape index: {}]   ;;  %s4074_s5 = inlined_call_operand.hbm [shape: f32[64,256], index: 5, kind: input, shape index: {}]   ;;  %s4075_s6 = inlined_call_operand.vmem [shape: f32[1,256], index: 6, kind: input, shape index: {}]   ;;  %s4076_s7 = inlined_call_operand.vmem [shape: f32[256,32], index: 7, kind: input, shape index: {}]   ;;  %s4077_s8 = inlined_call_operand.hbm [shape: f32[1,32], index: 8, kind: input, shape index: {}]   ;;  %s4078_s9 = inlined_call_operand.vmem [shape: f32[2,16,16,32], index: 9, kind: output, shape index: {}]  }
   0x1   :  { %4079 = sst [smem:[#allocation19_spill]] %s4072_s3 }
   0x2   :  { %4080 = sst [smem:[#allocation20_spill]] %s4073_s4 }
   0x3   :  { %4081 = sst [smem:[#allocation21_spill]] %s4074_s5 }
   0x4   :  { %14 = vsyncpa [#allocation5], 0 }
   0x5   :  { %15 = vsyncpa [#allocation7], 0 }
   0x6   :  { %16 = vsyncpa [#allocation10], 0  ;;  %s3239_s30 = smov 0   ;;  %s3241_s10 = smov 0  }
   0x7   :  { %s3243_s11 = smov 0   ;;  %s3245_s12 = smov 0  }
   0x8   :  { %s3247_s13 = smov 0  }
   0x9 LB: > { %s4082_s4 = sld [smem:[#allocation20_spill]]  ;;  %s2724_s17 = sadd.s32 4294967295, %s3179_s13   ;;  %s3179_s13 = sphi %s3247_s13, %s22_s13   ;;  %s3175_s12 = sphi %s3245_s12, %s4102_s12   ;;  %s3171_s11 = sphi %s3243_s11, %s4101_s11   ;;  %s3167_s10 = sphi %s3241_s10, %s4100_s10   ;;  %s3163_s30 = sphi %s3239_s30, %s4099_s30  }
   0xa   : > { %p2732_p0 = scmp.ge.s32.totalorder %s3179_s13, 1  ;;  %p293_p1 = scmp.lt.s32.totalorder %s3179_s13, 5 }
   0xb   : > { %p3270_p2 = scmp.eq.s32.totalorder %s2724_s17, 0  ;;  %s3181_s20 = smov [#allocation6]  }
   0xc   : > { %p3274_p3 = pnand %p2732_p0, %p293_p1  ;;  %s321_s21 = sshll.u32 %s3181_s20, 4  ;;  %s322_s21 = int_to_ptr.vmem [resolvable:$true] %s321_s21 }
   0xd   : > { %s31_s23 = sadd.s32 1, %s3171_s11  ;;  %s34_s24 = sadd.s32 1, %s3175_s12 }
   0xe   : > { %p2872_p4 = pneg %p3274_p3  ;;  %p32_p6 = scmp.ge.s32.totalorder %s31_s23, 2 }
   0xf   : > { %s319_s16 = sshll.u32 %s4082_s4, 4  ;;  %s4086_s3 = sld [smem:[#allocation19_spill]]  ;;  %s320_s16 = int_to_ptr.hbm [resolvable:$true] %s319_s16 }
  0x10   : > { %p3282_p5 = pnand %p3270_p2, %p2872_p4  ;;  %s4104_s23 = smov (%p32_p6, %s31_s23), 0 }
  0x11   : > { %s4106_s24 = smov (!%p32_p6, %s34_s24), %s3175_s12  ;;  %s3182_s28 = smov [#allocation4]  }
  0x12   : > { %2878 = dma.hbm_to_vmem [thread:$0]  (!%p3282_p5), %s320_s16, 16, %s322_s21, [#allocation7]  }
  0x13   : > { %s306_s29 = sshll.u32 %s3182_s28, 4  ;;  %p36_p7 = scmp.ge.s32.totalorder %s4106_s24, 2  ;;  %s307_s29 = int_to_ptr.vmem [resolvable:$true] %s306_s29 }
  0x14   : > { %s4087_s5 = sld [smem:[#allocation21_spill]]  ;;  %s3183_s17 = smov 128  }
  0x15   : > { %s304_s27 = sshll.u32 %s4086_s3, 4  ;;  %s4108_s24 = smov (%p36_p7, %s4106_s24), 0  ;;  %s305_s27 = int_to_ptr.hbm [resolvable:$true] %s304_s27 }
  0x16   : > { %s3184_s20 = smov 8   ;;  %s3185_s21 = smov [#allocation8]  }
  0x17   : > { %2875 = dma.hbm_to_vmem [thread:$0]  (!%p3282_p5), %s305_s27, 18432, %s307_s29, [#allocation5], %s3183_s17, %s3183_s17, %s3184_s20  }
  0x18   : > { %s332_s25 = sshll.u32 %s3185_s21, 4  ;;  %s3186_s26 = smov 256   ;;  %s333_s25 = int_to_ptr.vmem [resolvable:$true] %s332_s25 }
  0x19   : > { %s3187_s3 = smov 16   ;;  %s351_s14 = sshll.u32 %s4077_s8, 4  ;;  %s352_s14 = int_to_ptr.hbm [resolvable:$true] %s351_s14 }
  0x1a   : > { %s330_s16 = sshll.u32 %s4087_s5, 4  ;;  %s3188_s15 = smov [#allocation9]   ;;  %s331_s16 = int_to_ptr.hbm [resolvable:$true] %s330_s16 }
  0x1b   : > { %2881 = dma.hbm_to_vmem [thread:$0]  (!%p3282_p5), %s331_s16, 2048, %s333_s25, [#allocation7], %s3186_s26, %s3186_s26, %s3187_s3  }
  0x1c   : > { %s353_s5 = sshll.u32 %s3188_s15, 4  ;;  %420 = sbr.rel (%p3274_p3) target bundleno = 793 (0x319), region = 56  ;;  %s354_s5 = int_to_ptr.vmem [resolvable:$true] %s353_s5 }
  0x1d   : > { %2884 = dma.hbm_to_vmem [thread:$0]  (!%p3282_p5), %s352_s14, 16, %s354_s5, [#allocation10]  }
  0x21   : > { %3150 = dma.done.wait (%p3270_p2), [#allocation5], 18432  }
  0x22   : > { %3152 = vsyncadd (%p3270_p2), [#allocation5], 4294948864 }
  0x23   : > { %3154 = dma.done.wait (%p3270_p2), [#allocation7], 2064  }
  0x24   : > { %3156 = vsyncadd (%p3270_p2), [#allocation7], 4294965232 }
  0x25   : > { %3158 = dma.done.wait (%p3270_p2), [#allocation10], 16  }
  0x26   : > { %3160 = vsyncadd (%p3270_p2), [#allocation10], 4294967280  ;;  %s3325_s3 = sshll.u32 %s3163_s30, 3  ;;  %p509_p8 = scmp.lt.s32.totalorder %s3167_s10, 1  ;;  %v1088_v0 = vld [vmem:[#allocation4 + $0x78] sm:$0xff]  ;;  %v1087_v1 = vld [vmem:[#allocation4 + $0x70] sm:$0xff] }
  0x27   : > { %p511_p9 = scmp.lt.s32.totalorder %s3325_s3, 15  ;;  %s2746_s4 = sadd.s32 4294967295, %s3325_s3  ;;  %2804 = vmatpush.msra.mxu1 %v1088_v0  ;;  %2805 = vmatpush.msra.mxu2 %v1088_v0  ;;  %v1086_v2 = vld [vmem:[#allocation4 + $0x68] sm:$0xff]  ;;  %v1085_v3 = vld [vmem:[#allocation4 + $0x60] sm:$0xff]  ;;  %v1084_v5 = vld [vmem:[#allocation4 + $0x58] sm:$0xff]  ;;  %vm1844_vm0 = vcmask 523264  }
  0x28   : > { %s4110_s10 = smov (!%p509_p8, %s3167_s10), 1  ;;  %p521_p10 = scmp.gt.s32.totalorder %s2746_s4, 0  ;;  %2806 = vmatpush.msra.mxu3 %v1088_v0  ;;  %1221 = vmatpush.msra.mxu0 %v1088_v0  ;;  %v1083_v8 = vld [vmem:[#allocation4 + $0x50] sm:$0xff]  ;;  %v1082_v10 = vld [vmem:[#allocation4 + $0x48] sm:$0xff]  ;;  %v1081_v14 = vld [vmem:[#allocation4 + $0x40] sm:$0xff]  ;;  %vm2525_vm4 = vcmask 261120  }
  0x29   : > { %s3334_s5 = scalar_select %p511_p9, %s3325_s3, 15  ;;  %2807 = vmatpush.msra.mxu1 %v1087_v1  ;;  %2808 = vmatpush.msra.mxu2 %v1087_v1  ;;  %v1080_v17 = vld [vmem:[#allocation4 + $0x38] sm:$0xff]  ;;  %v1079_v18 = vld [vmem:[#allocation4 + $0x30] sm:$0xff]  ;;  %v1078_v20 = vld [vmem:[#allocation4 + $0x28] sm:$0xff] }
  0x2a   : > { %s3337_s18 = smul.u32 48, %s4110_s10  ;;  %p2747_p11 = scmp.lt.s32.totalorder %s2746_s4, 15  ;;  %2809 = vmatpush.msra.mxu3 %v1087_v1  ;;  %1222 = vmatpush.msra.mxu0 %v1087_v1  ;;  %v1077_v23 = vld [vmem:[#allocation4 + $0x20] sm:$0xff]  ;;  %v1076_v26 = vld [vmem:[#allocation4 + $0x18] sm:$0xff]  ;;  %v1075_v27 = vld [vmem:[#allocation4 + $0x10] sm:$0xff] }
  0x2b   : > { %s2852_s19 = smul.u32 3, %s3334_s5  ;;  %p564_p12 = scmp.gt.s32.totalorder %s3163_s30, 0  ;;  %2810 = vmatpush.msra.mxu1 %v1086_v2  ;;  %2811 = vmatpush.msra.mxu2 %v1086_v2  ;;  %v1074_v28 = vld [vmem:[#allocation4 + $0x8] sm:$0xff]  ;;  %v1073_v30 = vld [vmem:[#allocation4] sm:$0xff]  ;;  %v1120_v32 = vld [vmem:[#allocation4 + $0x178] sm:$0xff] }
  0x2c   : > { %s522_s22 = scalar_select %p521_p10, %s2746_s4, 0  ;;  %2812 = vmatpush.msra.mxu3 %v1086_v2  ;;  %1223 = vmatpush.msra.mxu0 %v1086_v2  ;;  %v1104_v34 = vld [vmem:[#allocation4 + $0xf8] sm:$0xff]  ;;  %v1119_v36 = vld [vmem:[#allocation4 + $0x170] sm:$0xff]  ;;  %v1118_v39 = vld [vmem:[#allocation4 + $0x168] sm:$0xff] }
  0x2d   : > { %s515_s27 = sadd.s32 %s3337_s18, %s2852_s19  ;;  %2813 = vmatpush.msra.mxu1 %v1085_v3  ;;  %2814 = vmatpush.msra.mxu2 %v1085_v3  ;;  %v1136_v37 = vld [vmem:[#allocation4 + $0x1f8] sm:$0xff]  ;;  %v1103_v38 = vld [vmem:[#allocation4 + $0xf0] sm:$0xff]  ;;  %v1102_v41 = vld [vmem:[#allocation4 + $0xe8] sm:$0xff]  ;;  %p567_p0 = scmp.lt.s32.totalorder %s3163_s30, 1 }
  0x2e   : > { %s2744_s29 = sshll.u32 %s515_s27, 3  ;;  %s4112_s22 = smov (!%p2747_p11, %s522_s22), 15  ;;  %2815 = vmatpush.msra.mxu3 %v1085_v3  ;;  %1224 = vmatpush.msra.mxu0 %v1085_v3  ;;  %v1135_v40 = vld [vmem:[#allocation4 + $0x1f0] sm:$0xff]  ;;  %v1117_v43 = vld [vmem:[#allocation4 + $0x160] sm:$0xff]  ;;  %v1134_v44 = vld [vmem:[#allocation4 + $0x1e8] sm:$0xff] }
  0x2f   : > { %s3345_s20 = scalar_lea.vmem %s4069_s0, %s2744_s29  ;;  %s2854_s25 = smul.u32 3, %s4112_s22  ;;  %2816 = vmatpush.msra.mxu1 %v1084_v5  ;;  %2817 = vmatpush.msra.mxu2 %v1084_v5  ;;  %v1101_v46 = vld [vmem:[#allocation4 + $0xe0] sm:$0xff]  ;;  %v1116_v47 = vld [vmem:[#allocation4 + $0x158] sm:$0xff]  ;;  %v1115_v51 = vld [vmem:[#allocation4 + $0x150] sm:$0xff] }
  0x30   : > { %s565_s21 = scalar_select %p564_p12, 1, 0  ;;  %v3351_v4 = vld [vmem:[%s3345_s20 + $0x18] sm:$0xff]  ;;  %v3355_v6 = vld [vmem:[%s3345_s20 + $0x48] sm:$0xff]  ;;  %2818 = vmatpush.msra.mxu3 %v1084_v5  ;;  %1225 = vmatpush.msra.mxu0 %v1084_v5  ;;  %v3371_v11 = vld [vmem:[%s3345_s20 + $0x20] sm:$0xff] }
  0x31   : > { %608 = vst [vmem:[#allocation2 + $0x30] sm:$0xff] %v3351_v4  ;;  %v3359_v7 = vld [vmem:[%s3345_s20 + $0x78] sm:$0xff]  ;;  %s529_s28 = sadd.s32 %s2854_s25, %s3337_s18  ;;  %2819 = vmatpush.msra.mxu1 %v1083_v8  ;;  %2820 = vmatpush.msra.mxu2 %v1083_v8  ;;  %v3375_v12 = vld [vmem:[%s3345_s20 + $0x50] sm:$0xff]  ;;  %v3383_v16 = vld [vmem:[%s3345_s20 + $0x80] sm:$0xff]  ;;  %s2803_s22 = sadd.s32 8, %s3325_s3 }
  0x32   : > { %s566_s26 = scvt.s32.f32 %s565_s21  ;;  %614 = vst [vmem:[#allocation2 + $0x60] sm:$0xff] %v3355_v6  ;;  %s2752_s14 = sshll.u32 %s529_s28, 3  ;;  %2821 = vmatpush.msra.mxu3 %v1083_v8  ;;  %1226 = vmatpush.msra.mxu0 %v1083_v8  ;;  %v3388_v19 = vld [vmem:[%s3345_s20 + $0x30] sm:$0xff]  ;;  %v3392_v21 = vld [vmem:[%s3345_s20 + $0x60] sm:$0xff]  ;;  %v3405_v29 = vld [vmem:[%s3345_s20 + $0x38] sm:$0xff] }
  0x33   : > { %620 = vst [vmem:[#allocation2 + $0x90] sm:$0xff] %v3359_v7  ;;  %s3366_s19 = scalar_lea.vmem %s4070_s1, %s2752_s14  ;;  %2822 = vmatpush.msra.mxu1 %v1082_v10  ;;  %2823 = vmatpush.msra.mxu2 %v1082_v10  ;;  %v3400_v25 = vld [vmem:[%s3345_s20 + $0x90] sm:$0xff]  ;;  %v3409_v31 = vld [vmem:[%s3345_s20 + $0x68] sm:$0xff]  ;;  %v3413_v33 = vld [vmem:[%s3345_s20] sm:$0xff]  ;;  %p3650_p13 = scmp.lt.s32.totalorder %s2803_s22, 15 }
  0x34   : > { %v3368_v9 = vstv %s566_s26  ;;  %609 = vst [vmem:[#allocation2 + $0x38] sm:$0xff] %v3371_v11  ;;  %v570_v13 = vld [vmem:[%s3366_s19] sm:$0xff]  ;;  %2824 = vmatpush.msra.mxu3 %v1082_v10  ;;  %1227 = vmatpush.msra.mxu0 %v1082_v10  ;;  %v571_v22 = vld [vmem:[%s3366_s19 + $0x8] sm:$0xff]  ;;  %v3417_v35 = vld [vmem:[%s3345_s20 + $0x98] sm:$0xff]  ;;  %s568_s16 = scalar_select %p567_p0, 1, 0 }
  0x35   : > { %615 = vst [vmem:[#allocation2 + $0x68] sm:$0xff] %v3375_v12  ;;  %v3380_v15 = vmul.f32 %v3368_v9, %v570_v13  ;;  %2825 = vmatpush.msra.mxu1 %v1081_v14  ;;  %2826 = vmatpush.msra.mxu2 %v1081_v14  ;;  %v3397_v24 = vmul.f32 %v3368_v9, %v571_v22  ;;  %v572_v42 = vld [vmem:[%s3366_s19 + $0x10] sm:$0x3]  ;;  %v1100_v49 = vld [vmem:[#allocation4 + $0xd8] sm:$0xff]  ;;  %v1099_v54 = vld [vmem:[#allocation4 + $0xd0] sm:$0xff]  ;;  %s4114_s22 = smov (!%p3650_p13, %s2803_s22), 15 }
  0x36   : > { %621 = vst [vmem:[#allocation2 + $0x98] sm:$0xff] %v3383_v16  ;;  %2827 = vmatpush.msra.mxu3 %v1081_v14  ;;  %1228 = vmatpush.msra.mxu0 %v1081_v14  ;;  %v576_v45 = vmul.f32 %v3368_v9, %v572_v42  ;;  %v1133_v48 = vld [vmem:[#allocation4 + $0x1e0] sm:$0xff]  ;;  %v3427_v50 = vld [vmem:[%s3345_s20 + $0x8] sm:$0xff]  ;;  %v1114_v55 = vld [vmem:[#allocation4 + $0x148] sm:$0xff]  ;;  %s4116_s22 = smov (!%p3650_p13, %s4114_s22), 15  ;;  %s569_s30 = scvt.s32.f32 %s568_s16 }
  0x37   : > { %577 = vst [vmem:[#allocation2] sm:$0xff] %v3380_v15  ;;  %2828 = vmatpush.msra.mxu1 %v1080_v17  ;;  %2829 = vmatpush.msra.mxu2 %v1080_v17  ;;  %v1132_v52 = vld [vmem:[#allocation4 + $0x1d8] sm:$0xff]  ;;  %v1131_v56 = vld [vmem:[#allocation4 + $0x1d0] sm:$0xff]  ;;  %v1098_v58 = vld [vmem:[#allocation4 + $0xc8] sm:$0xff]  ;;  %s2855_s3 = smul.u32 3, %s4116_s22  ;;  %s2759_s21 = sshll.u32 %s3334_s5, 1 }
  0x38   : > { %2830 = vmatpush.msra.mxu3 %v1080_v17  ;;  %1229 = vmatpush.msra.mxu0 %v1080_v17  ;;  %611 = vst [vmem:[#allocation2 + $0x48] sm:$0xff] %v3388_v19  ;;  %v1152_v53 = vld [vmem:[#allocation4 + $0x278] sm:$0xff]  ;;  %v1151_v57 = vld [vmem:[#allocation4 + $0x270] sm:$0xff]  ;;  %v1113_v59 = vld [vmem:[#allocation4 + $0x140] sm:$0xff] }
  0x39   : > { %2831 = vmatpush.msra.mxu1 %v1079_v18  ;;  %2832 = vmatpush.msra.mxu2 %v1079_v18  ;;  %617 = vst [vmem:[#allocation2 + $0x78] sm:$0xff] %v3392_v21  ;;  %v1130_v60 = vld [vmem:[#allocation4 + $0x1c8] sm:$0xff]  ;;  %v1097_v62 = vld [vmem:[#allocation4 + $0xc0] sm:$0xff]  ;;  %v1112_v63 = vld [vmem:[#allocation4 + $0x138] sm:$0xff]  ;;  %s546_s29 = sadd.s32 %s2855_s3, %s3337_s18 }
  0x3a   : > { %2833 = vmatpush.msra.mxu3 %v1079_v18  ;;  %1230 = vmatpush.msra.mxu0 %v1079_v18  ;;  %623 = vst [vmem:[#allocation2 + $0xa8] sm:$0xff] %v3400_v25  ;;  %v1150_v61 = vld [vmem:[#allocation4 + $0x268] sm:$0xff]  ;;  %v582_v0 = vld [vmem:[%s3345_s20 + $0x10] sm:$0x3]  ;;  %v1096_v3 = vld [vmem:[#allocation4 + $0xb8] sm:$0xff]  ;;  %s2757_s17 = sshll.u32 %s546_s29, 3 }
  0x3b   : > { %2834 = vmatpush.msra.mxu1 %v1078_v20  ;;  %2835 = vmatpush.msra.mxu2 %v1078_v20  ;;  %578 = vst [vmem:[#allocation2 + $0x8] sm:$0xff] %v3397_v24  ;;  %v1129_v1 = vld [vmem:[#allocation4 + $0x1c0] sm:$0xff]  ;;  %v1111_v5 = vld [vmem:[#allocation4 + $0x130] sm:$0xff]  ;;  %v1128_v8 = vld [vmem:[#allocation4 + $0x1b8] sm:$0xff]  ;;  %s548_s18 = scalar_lea.vmem %s4071_s2, %s2757_s17 }
  0x3c   : > { %2836 = vmatpush.msra.mxu3 %v1078_v20  ;;  %1231 = vmatpush.msra.mxu0 %v1078_v20  ;;  %612 = vst [vmem:[#allocation2 + $0x50] sm:$0xff] %v3405_v29  ;;  %v1149_v2 = vld [vmem:[#allocation4 + $0x260] sm:$0xff]  ;;  %v1148_v9 = vld [vmem:[#allocation4 + $0x258] sm:$0xff]  ;;  %v1095_v10 = vld [vmem:[#allocation4 + $0xb0] sm:$0xff] }
  0x3d   : > { %2837 = vmatpush.msra.mxu1 %v1077_v23  ;;  %2838 = vmatpush.msra.mxu2 %v1077_v23  ;;  %618 = vst [vmem:[#allocation2 + $0x80] sm:$0xff] %v3409_v31  ;;  %v1110_v13 = vld [vmem:[#allocation4 + $0x128] sm:$0xff]  ;;  %v1127_v14 = vld [vmem:[#allocation4 + $0x1b0] sm:$0xff]  ;;  %v1109_v18 = vld [vmem:[#allocation4 + $0x120] sm:$0xff] }
  0x3e   : > { %2839 = vmatpush.msra.mxu3 %v1077_v23  ;;  %1232 = vmatpush.msra.mxu0 %v1077_v23  ;;  %605 = vst [vmem:[#allocation2 + $0x18] sm:$0xff] %v3413_v33  ;;  %v1094_v17 = vld [vmem:[#allocation4 + $0xa8] sm:$0xff]  ;;  %v1093_v23 = vld [vmem:[#allocation4 + $0xa0] sm:$0xff] }
  0x3f   : > { %2840 = vmatpush.msra.mxu1 %v1076_v26  ;;  %2841 = vmatpush.msra.mxu2 %v1076_v26  ;;  %624 = vst [vmem:[#allocation2 + $0xb0] sm:$0xff] %v3417_v35  ;;  %v1126_v20 = vld [vmem:[#allocation4 + $0x1a8] sm:$0xff]  ;;  %v1105_v42 = vld [vmem:[#allocation4 + $0x100] sm:$0xff] }
  0x40   : > { %2842 = vmatpush.msra.mxu3 %v1076_v26  ;;  %1233 = vmatpush.msra.mxu0 %v1076_v26  ;;  %579 = vst [vmem:[#allocation2 + $0x10] sm:$0x3] %v576_v45  ;;  %v1146_v22 = vld [vmem:[#allocation4 + $0x248] sm:$0xff]  ;;  %v1125_v26 = vld [vmem:[#allocation4 + $0x1a0] sm:$0xff] }
  0x41   : > { %2843 = vmatpush.msra.mxu1 %v1075_v27  ;;  %2844 = vmatpush.msra.mxu2 %v1075_v27  ;;  %606 = vst [vmem:[#allocation2 + $0x20] sm:$0xff] %v3427_v50  ;;  %v1089_v45 = vld [vmem:[#allocation4 + $0x80] sm:$0xff] }
  0x42   : > { %2845 = vmatpush.msra.mxu3 %v1075_v27  ;;  %1234 = vmatpush.msra.mxu0 %v1075_v27  ;;  %607 = vst [vmem:[#allocation2 + $0x28] sm:$0x3] %v582_v0  ;;  %v1145_v27 = vld [vmem:[#allocation4 + $0x240] sm:$0xff] }
  0x43   : > { %2846 = vmatpush.msra.mxu1 %v1074_v28  ;;  %2847 = vmatpush.msra.mxu2 %v1074_v28  ;;  %v1137_v0 = vld [vmem:[#allocation4 + $0x200] sm:$0xff] }
  0x44   : > { %2848 = vmatpush.msra.mxu3 %v1074_v28  ;;  %1235 = vmatpush.msra.mxu0 %v1074_v28  ;;  %v1092_v28 = vld [vmem:[#allocation4 + $0x98] sm:$0xff] }
  0x45   : > { %2849 = vmatpush.msra.mxu1 %v1073_v30  ;;  %2850 = vmatpush.msra.mxu2 %v1073_v30 }
  0x46   : > { %1249 = vmatmul.f32.vlgmr.msra.gmra.mxu1 %v3351_v4  ;;  %1261 = vmatmul.f32.vlgmr.msra.gmra.mxu2 %v3355_v6 }
  0x47   : > { %1351 = vmatpush.msrb.mxu2 %v1120_v32  ;;  %2851 = vmatpush.msra.mxu3 %v1073_v30  ;;  %v1124_v32 = vld [vmem:[#allocation4 + $0x198] sm:$0xff] }
  0x48   : > { %1286 = vmatpush.msrb.mxu1 %v1104_v34  ;;  %1273 = vmatmul.f32.vlgmr.msra.gmra.mxu3 %v3359_v7  ;;  %v1144_v34 = vld [vmem:[#allocation4 + $0x238] sm:$0xff] }
  0x49   : > { %1352 = vmatpush.msrb.mxu2 %v1119_v36  ;;  %1416 = vmatpush.msrb.mxu3 %v1136_v37  ;;  %v1091_v36 = vld [vmem:[#allocation4 + $0x90] sm:$0xff]  ;;  %v1106_v37 = vld [vmem:[#allocation4 + $0x108] sm:$0xff] }
  0x4a   : > { %1287 = vmatpush.msrb.mxu1 %v1103_v38  ;;  %1236 = vmatpush.msra.mxu0 %v1073_v30  ;;  %v1107_v30 = vld [vmem:[#allocation4 + $0x110] sm:$0xff] }
  0x4b   : > { %1353 = vmatpush.msrb.mxu2 %v1118_v39  ;;  %1417 = vmatpush.msrb.mxu3 %v1135_v40  ;;  %v1123_v38 = vld [vmem:[#allocation4 + $0x190] sm:$0xff]  ;;  %v585_v40 = vld [vmem:[%s3345_s20 + $0x28] sm:$0x3] }
  0x4c   : > { %1288 = vmatpush.msrb.mxu1 %v1102_v41  ;;  %1237 = vmatmul.f32.vlgmr.msra.gmra.mxu0 %v3380_v15  ;;  %v1147_v15 = vld [vmem:[#allocation4 + $0x250] sm:$0xff]  ;;  %v1090_v41 = vld [vmem:[#allocation4 + $0x88] sm:$0xff]  ;;  %610 = vst [vmem:[#allocation2 + $0x40] sm:$0x3] %v585_v40  ;;  %v1161_v40 = vld [vmem:[#allocation4 + $0x2c0] sm:$0xff] }
  0x4d   : > { %1354 = vmatpush.msrb.mxu2 %v1117_v43  ;;  %1418 = vmatpush.msrb.mxu3 %v1134_v44  ;;  %v1143_v39 = vld [vmem:[#allocation4 + $0x230] sm:$0xff]  ;;  %v1122_v43 = vld [vmem:[#allocation4 + $0x188] sm:$0xff] }
  0x4e   : > { %1289 = vmatpush.msrb.mxu1 %v1101_v46  ;;  %1264 = vmatmul.f32.gmra.mxu2 %v3375_v12  ;;  %v1142_v44 = vld [vmem:[#allocation4 + $0x228] sm:$0xff]  ;;  %v704_v46 = vld [vmem:[#allocation2 + $0x2] sm:$0xff] }
  0x4f   : > { %1252 = vmatmul.f32.gmra.mxu1 %v3371_v11  ;;  %1355 = vmatpush.msrb.mxu2 %v1116_v47  ;;  %v672_v47 = vld [vmem:[#allocation2 + $0x1] sm:$0xff] }
  0x50   : > { %1419 = vmatpush.msrb.mxu3 %v1133_v48  ;;  %1290 = vmatpush.msrb.mxu1 %v1100_v49  ;;  %v1121_v48 = vld [vmem:[#allocation4 + $0x180] sm:$0xff] }
  0x51   : > { %1276 = vmatmul.f32.gmra.mxu3 %v3383_v16  ;;  %1356 = vmatpush.msrb.mxu2 %v1115_v51  ;;  %v1141_v49 = vld [vmem:[#allocation4 + $0x220] sm:$0xff]  ;;  %v1184_v51 = vld [vmem:[#allocation4 + $0x378] sm:$0xff] }
  0x52   : > { %1420 = vmatpush.msrb.mxu3 %v1132_v52  ;;  %1481 = vmatpush.msrb.mxu0 %v1152_v53  ;;  %v1140_v52 = vld [vmem:[#allocation4 + $0x218] sm:$0xff] }
  0x53   : > { %1291 = vmatpush.msrb.mxu1 %v1099_v54  ;;  %1357 = vmatpush.msrb.mxu2 %v1114_v55  ;;  %v1200_v53 = vld [vmem:[#allocation4 + $0x3f8] sm:$0xff]  ;;  %v1183_v55 = vld [vmem:[#allocation4 + $0x370] sm:$0xff] }
  0x54   : > { %1421 = vmatpush.msrb.mxu3 %v1131_v56  ;;  %1482 = vmatpush.msrb.mxu0 %v1151_v57  ;;  %v1168_v54 = vld [vmem:[#allocation4 + $0x2f8] sm:$0xff]  ;;  %v1139_v56 = vld [vmem:[#allocation4 + $0x210] sm:$0xff] }
  0x55   : > { %1292 = vmatpush.msrb.mxu1 %v1098_v58  ;;  %1358 = vmatpush.msrb.mxu2 %v1113_v59  ;;  %v1199_v57 = vld [vmem:[#allocation4 + $0x3f0] sm:$0xff]  ;;  %v1182_v59 = vld [vmem:[#allocation4 + $0x368] sm:$0xff] }
  0x56   : > { %1422 = vmatpush.msrb.mxu3 %v1130_v60  ;;  %1483 = vmatpush.msrb.mxu0 %v1150_v61  ;;  %v1167_v58 = vld [vmem:[#allocation4 + $0x2f0] sm:$0xff]  ;;  %v1138_v60 = vld [vmem:[#allocation4 + $0x208] sm:$0xff]  ;;  %v705_v61 = vld [vmem:[#allocation2 + $0xa] sm:$0xff] }
  0x57   : > { %1293 = vmatpush.msrb.mxu1 %v1097_v62  ;;  %1267 = vmatmul.f32.gmra.mxu2 %v3392_v21  ;;  %v673_v62 = vld [vmem:[#allocation2 + $0x9] sm:$0xff] }
  0x58   : > { %1255 = vmatmul.f32.gmra.mxu1 %v3388_v19  ;;  %1359 = vmatpush.msrb.mxu2 %v1112_v63  ;;  %v1198_v63 = vld [vmem:[#allocation4 + $0x3e8] sm:$0xff] }
  0x59   : > { %1423 = vmatpush.msrb.mxu3 %v1129_v1  ;;  %1484 = vmatpush.msrb.mxu0 %v1149_v2  ;;  %v1166_v1 = vld [vmem:[#allocation4 + $0x2e8] sm:$0xff]  ;;  %v1216_v2 = vld [vmem:[#allocation4 + $0x478] sm:$0xff] }
  0x5a   : > { %1294 = vmatpush.msrb.mxu1 %v1096_v3  ;;  %1240 = vmatmul.f32.gmra.mxu0 %v3397_v24  ;;  %v1108_v24 = vld [vmem:[#allocation4 + $0x118] sm:$0xff]  ;;  %v1181_v3 = vld [vmem:[#allocation4 + $0x360] sm:$0xff] }
  0x5b   : > { %1279 = vmatmul.f32.gmra.mxu3 %v3400_v25  ;;  %1360 = vmatpush.msrb.mxu2 %v1111_v5  ;;  %v1197_v5 = vld [vmem:[#allocation4 + $0x3e0] sm:$0xff] }
  0x5c   : > { %1424 = vmatpush.msrb.mxu3 %v1128_v8  ;;  %1485 = vmatpush.msrb.mxu0 %v1148_v9  ;;  %v1165_v8 = vld [vmem:[#allocation4 + $0x2e0] sm:$0xff]  ;;  %v588_v9 = vld [vmem:[%s3345_s20 + $0x40] sm:$0x3] }
  0x5d   : > { %1295 = vmatpush.msrb.mxu1 %v1095_v10  ;;  %1361 = vmatpush.msrb.mxu2 %v1110_v13  ;;  %v1215_v10 = vld [vmem:[#allocation4 + $0x470] sm:$0xff]  ;;  %v1180_v13 = vld [vmem:[#allocation4 + $0x358] sm:$0xff]  ;;  %613 = vst [vmem:[#allocation2 + $0x58] sm:$0x3] %v588_v9 }
  0x5e   : > { %1425 = vmatpush.msrb.mxu3 %v1127_v14  ;;  %1486 = vmatpush.msrb.mxu0 %v1147_v15  ;;  %v1196_v14 = vld [vmem:[#allocation4 + $0x3d8] sm:$0xff] }
  0x5f   : > { %1296 = vmatpush.msrb.mxu1 %v1094_v17  ;;  %1362 = vmatpush.msrb.mxu2 %v1109_v18  ;;  %v1164_v15 = vld [vmem:[#allocation4 + $0x2d8] sm:$0xff]  ;;  %v3447_v17 = vld [vmem:[#allocation2 + $0x1a] sm:$0xff] }
  0x60   : > { %1426 = vmatpush.msrb.mxu3 %v1126_v20  ;;  %1487 = vmatpush.msrb.mxu0 %v1146_v22  ;;  %v1214_v18 = vld [vmem:[#allocation4 + $0x468] sm:$0xff]  ;;  %v1179_v20 = vld [vmem:[#allocation4 + $0x350] sm:$0xff]  ;;  %v1213_v22 = vld [vmem:[#allocation4 + $0x460] sm:$0xff] }
  0x61   : > { %1297 = vmatpush.msrb.mxu1 %v1093_v23  ;;  %1270 = vmatmul.f32.gmra.mxu2 %v3409_v31  ;;  %v769_v23 = vld [vmem:[#allocation2 + $0x21] sm:$0xff] }
  0x62   : > { %1258 = vmatmul.f32.gmra.mxu1 %v3405_v29  ;;  %1363 = vmatpush.msrb.mxu2 %v1108_v24  ;;  %v1212_v24 = vld [vmem:[#allocation4 + $0x458] sm:$0xff] }
  0x63   : > { %1427 = vmatpush.msrb.mxu3 %v1125_v26  ;;  %1488 = vmatpush.msrb.mxu0 %v1145_v27  ;;  %v1163_v26 = vld [vmem:[#allocation4 + $0x2d0] sm:$0xff]  ;;  %v1178_v27 = vld [vmem:[#allocation4 + $0x348] sm:$0xff] }
  0x64   : > { %1298 = vmatpush.msrb.mxu1 %v1092_v28  ;;  %1243 = vmatmul.f32.gmra.mxu0 %v3413_v33  ;;  %v1194_v28 = vld [vmem:[#allocation4 + $0x3c8] sm:$0xff] }
  0x65   : > { %1282 = vmatmul.f32.gmra.mxu3 %v3417_v35  ;;  %1364 = vmatpush.msrb.mxu2 %v1107_v30  ;;  %v1211_v30 = vld [vmem:[#allocation4 + $0x450] sm:$0xff] }
  0x66   : > { %1428 = vmatpush.msrb.mxu3 %v1124_v32  ;;  %1489 = vmatpush.msrb.mxu0 %v1144_v34  ;;  %v1162_v32 = vld [vmem:[#allocation4 + $0x2c8] sm:$0xff]  ;;  %v3451_v34 = vld [vmem:[#allocation2 + $0x22] sm:$0xff] }
  0x67   : > { %1299 = vmatpush.msrb.mxu1 %v1091_v36  ;;  %1365 = vmatpush.msrb.mxu2 %v1106_v37  ;;  %v3454_v36 = vld [vmem:[#allocation2 + $0x31] sm:$0xff] }
  0x68   : > { %1429 = vmatpush.msrb.mxu3 %v1123_v38  ;;  %1490 = vmatpush.msrb.mxu0 %v1143_v39  ;;  %v1177_v37 = vld [vmem:[#allocation4 + $0x340] sm:$0xff]  ;;  %v1210_v39 = vld [vmem:[#allocation4 + $0x448] sm:$0xff] }
  0x69   : > { %1300 = vmatpush.msrb.mxu1 %v1090_v41  ;;  %1366 = vmatpush.msrb.mxu2 %v1105_v42  ;;  %v1193_v38 = vld [vmem:[#allocation4 + $0x3c0] sm:$0xff]  ;;  %v3462_v42 = vld [vmem:[#allocation2 + $0x39] sm:$0xff] }
  0x6a   : > { %1430 = vmatpush.msrb.mxu3 %v1122_v43  ;;  %1491 = vmatpush.msrb.mxu0 %v1142_v44  ;;  %v3459_v41 = vld [vmem:[#allocation2 + $0x32] sm:$0xff]  ;;  %v1176_v43 = vld [vmem:[#allocation4 + $0x338] sm:$0xff] }
  0x6b   : > { %1301 = vmatpush.msrb.mxu1 %v1089_v45  ;;  %1367 = vmatmul.f32.vlgmr.msrb.gmra.mxu2 %v704_v46  ;;  %v1209_v44 = vld [vmem:[#allocation4 + $0x440] sm:$0xff]  ;;  %v1160_v45 = vld [vmem:[#allocation4 + $0x2b8] sm:$0xff]  ;;  %v3467_v46 = vld [vmem:[#allocation2 + $0x3a] sm:$0xff] }
  0x6c   : > { %1302 = vmatmul.f32.vlgmr.msrb.gmra.mxu1 %v672_v47  ;;  %1431 = vmatpush.msrb.mxu3 %v1121_v48  ;;  %v3470_v47 = vld [vmem:[#allocation2 + $0x49] sm:$0xff]  ;;  %v1175_v48 = vld [vmem:[#allocation4 + $0x330] sm:$0xff] }
  0x6d   : > { %1492 = vmatpush.msrb.mxu0 %v1141_v49  ;;  %1611 = vmatpush.msra.mxu2 %v1184_v51  ;;  %v594_v49 = vld [vmem:[%s3345_s20 + $0x70] sm:$0x3]  ;;  %v1191_v51 = vld [vmem:[#allocation4 + $0x3b0] sm:$0xff] }
  0x6e   : > { %1246 = vmatmul.f32.gmra.mxu0 %v3427_v50  ;;  %1432 = vmatmul.f32.vlgmr.msrb.gmra.mxu3 %v3413_v33  ;;  %v768_v33 = vld [vmem:[#allocation2 + $0x19] sm:$0xff]  ;;  %619 = vst [vmem:[#allocation2 + $0x88] sm:$0x3] %v594_v49 }
  0x6f   : > { %1493 = vmatpush.msrb.mxu0 %v1140_v52  ;;  %1676 = vmatpush.msra.mxu3 %v1200_v53  ;;  %v1208_v52 = vld [vmem:[#allocation4 + $0x438] sm:$0xff]  ;;  %v1159_v53 = vld [vmem:[#allocation4 + $0x2b0] sm:$0xff] }
  0x70   : > { %1546 = vmatpush.msra.mxu1 %v1168_v54  ;;  %1612 = vmatpush.msra.mxu2 %v1183_v55  ;;  %v3476_v54 = vld [vmem:[#allocation2 + $0x4a] sm:$0xff] }
  0x71   : > { %1494 = vmatpush.msrb.mxu0 %v1139_v56  ;;  %1677 = vmatpush.msra.mxu3 %v1199_v57  ;;  %v3479_v55 = vld [vmem:[#allocation2 + $0x51] sm:$0xff] }
  0x72   : > { %1547 = vmatpush.msra.mxu1 %v1167_v58  ;;  %1613 = vmatpush.msra.mxu2 %v1182_v59  ;;  %v1174_v56 = vld [vmem:[#allocation4 + $0x328] sm:$0xff]  ;;  %v1207_v58 = vld [vmem:[#allocation4 + $0x430] sm:$0xff] }
  0x73   : > { %1495 = vmatpush.msrb.mxu0 %v1138_v60  ;;  %1370 = vmatmul.f32.gmra.mxu2 %v705_v61  ;;  %v1190_v57 = vld [vmem:[#allocation4 + $0x3a8] sm:$0xff]  ;;  %v3487_v61 = vld [vmem:[#allocation2 + $0x61] sm:$0xff] }
  0x74   : > { %1305 = vmatmul.f32.gmra.mxu1 %v673_v62  ;;  %1678 = vmatpush.msra.mxu3 %v1198_v63  ;;  %v1158_v59 = vld [vmem:[#allocation4 + $0x2a8] sm:$0xff]  ;;  %v1173_v62 = vld [vmem:[#allocation4 + $0x320] sm:$0xff]  ;;  %v597_v63 = vld [vmem:[%s3345_s20 + $0x88] sm:$0x3] }
  0x75   : > { %1496 = vmatpush.msrb.mxu0 %v1137_v0  ;;  %1548 = vmatpush.msra.mxu1 %v1166_v1  ;;  %v3484_v60 = vld [vmem:[#allocation2 + $0x52] sm:$0xff]  ;;  %622 = vst [vmem:[#allocation2 + $0xa0] sm:$0x3] %v597_v63  ;;  %v1837_v63 = vld [vmem:[#allocation8 + $0x78] sm:$0xff] }
  0x76   : > { %1435 = vmatmul.f32.gmra.mxu3 %v3427_v50  ;;  %1497 = vmatmul.f32.vlgmr.msrb.gmra.mxu0 %v768_v33  ;;  %v1195_v50 = vld [vmem:[#allocation4 + $0x3d0] sm:$0xff]  ;;  %v1206_v0 = vld [vmem:[#allocation4 + $0x428] sm:$0xff]  ;;  %v1157_v1 = vld [vmem:[#allocation4 + $0x2a0] sm:$0xff] }
  0x77   : > { %1741 = vmatpush.msra.mxu0 %v1216_v2  ;;  %1614 = vmatpush.msra.mxu2 %v1181_v3  ;;  %v1172_v3 = vld [vmem:[#allocation4 + $0x318] sm:$0xff] }
  0x78   : > { %1679 = vmatpush.msra.mxu3 %v1197_v5  ;;  %1549 = vmatpush.msra.mxu1 %v1165_v8  ;;  %v1205_v5 = vld [vmem:[#allocation4 + $0x420] sm:$0xff]  ;;  %v1156_v8 = vld [vmem:[#allocation4 + $0x298] sm:$0xff] }
  0x79   : > { %1742 = vmatpush.msra.mxu0 %v1215_v10  ;;  %1615 = vmatpush.msra.mxu2 %v1180_v13  ;;  %v3504_v10 = vld [vmem:[#allocation2 + $0x79] sm:$0xff] }
  0x7a   : > { %1680 = vmatpush.msra.mxu3 %v1196_v14  ;;  %1550 = vmatpush.msra.mxu1 %v1164_v15  ;;  %v1171_v13 = vld [vmem:[#allocation4 + $0x310] sm:$0xff]  ;;  %v1204_v15 = vld [vmem:[#allocation4 + $0x418] sm:$0xff] }
  0x7b   : > { %1373 = vmatmul.f32.gmra.mxu2 %v3447_v17  ;;  %1743 = vmatpush.msra.mxu0 %v1214_v18  ;;  %v1187_v14 = vld [vmem:[#allocation4 + $0x390] sm:$0xff] }
  0x7c   : > { %1308 = vmatmul.f32.gmra.mxu1 %v768_v33  ;;  %1616 = vmatpush.msra.mxu2 %v1179_v20  ;;  %v3493_v33 = vld [vmem:[#allocation2 + $0x62] sm:$0xff]  ;;  %v3510_v20 = vld [vmem:[#allocation2 + $0x7a] sm:$0xff] }
  0x7d   : > { %1744 = vmatpush.msra.mxu0 %v1213_v22  ;;  %1681 = vmatpush.msra.mxu3 %v1195_v50  ;;  %v1155_v18 = vld [vmem:[#allocation4 + $0x290] sm:$0xff]  ;;  %v1170_v50 = vld [vmem:[#allocation4 + $0x308] sm:$0xff] }
  0x7e   : > { %1438 = vmatmul.f32.gmra.mxu3 %v3351_v4  ;;  %1500 = vmatmul.f32.gmra.mxu0 %v769_v23  ;;  %v591_v4 = vld [vmem:[%s3345_s20 + $0x58] sm:$0x3]  ;;  %v3513_v22 = vld [vmem:[#allocation2 + $0x81] sm:$0xff] }
  0x7f   : > { %1745 = vmatpush.msra.mxu0 %v1212_v24  ;;  %1551 = vmatpush.msra.mxu1 %v1163_v26  ;;  %616 = vst [vmem:[#allocation2 + $0x70] sm:$0x3] %v591_v4  ;;  %v1186_v24 = vld [vmem:[#allocation4 + $0x388] sm:$0xff]  ;;  %v1203_v26 = vld [vmem:[#allocation4 + $0x410] sm:$0xff]  ;;  %v1185_v4 = vld [vmem:[#allocation4 + $0x380] sm:$0xff] }
  0x80   : > { %1617 = vmatpush.msra.mxu2 %v1178_v27  ;;  %1682 = vmatpush.msra.mxu3 %v1194_v28  ;;  %v1154_v27 = vld [vmem:[#allocation4 + $0x288] sm:$0xff]  ;;  %v3526_v28 = vld [vmem:[#allocation2 + $0x82] sm:$0xff] }
  0x81   : > { %1746 = vmatpush.msra.mxu0 %v1211_v30  ;;  %1552 = vmatpush.msra.mxu1 %v1162_v32  ;;  %v3529_v30 = vld [vmem:[#allocation2 + $0x91] sm:$0xff]  ;;  %v3551_v49 = vld [vmem:[#allocation2 + $0x9a] sm:$0xff] }
  0x82   : > { %1618 = vmatpush.msra.mxu2 %v1177_v37  ;;  %1683 = vmatpush.msra.mxu3 %v1193_v38  ;;  %v603_v37 = vld [vmem:[%s3345_s20 + $0xb8] sm:$0x3] }
  0x83   : > { %1376 = vmatmul.f32.gmra.mxu2 %v3451_v34  ;;  %1747 = vmatpush.msra.mxu0 %v1210_v39  ;;  %v1202_v38 = vld [vmem:[#allocation4 + $0x408] sm:$0xff]  ;;  %v1153_v39 = vld [vmem:[#allocation4 + $0x280] sm:$0xff]  ;;  %628 = vst [vmem:[#allocation2 + $0xd0] sm:$0x3] %v603_v37 }
  0x84   : > { %1311 = vmatmul.f32.gmra.mxu1 %v769_v23  ;;  %1619 = vmatpush.msra.mxu2 %v1176_v43  ;;  %v3521_v23 = vld [vmem:[%s3345_s20 + $0xb0] sm:$0xff] }
  0x85   : > { %1553 = vmatpush.msra.mxu1 %v1161_v40  ;;  %1748 = vmatpush.msra.mxu0 %v1209_v44  ;;  %627 = vst [vmem:[#allocation2 + $0xc8] sm:$0xff] %v3521_v23  ;;  %v3537_v40 = vld [vmem:[#allocation2 + $0x92] sm:$0xff] }
  0x86   : > { %1441 = vmatmul.f32.gmra.mxu3 %v3371_v11  ;;  %1503 = vmatmul.f32.gmra.mxu0 %v3454_v36  ;;  %v1192_v11 = vld [vmem:[#allocation4 + $0x3b8] sm:$0xff] }
  0x87   : > { %1684 = vmatpush.msra.mxu3 %v1192_v11  ;;  %1554 = vmatpush.msra.mxu1 %v1160_v45  ;;  %v3496_v2 = vld [vmem:[#allocation2 + $0x69] sm:$0xff]  ;;  %v3542_v11 = vld [vmem:[#allocation2 + $0x99] sm:$0xff] }
  0x88   : > { %1620 = vmatpush.msra.mxu2 %v1175_v48  ;;  %1749 = vmatpush.msra.mxu0 %v1208_v52  ;;  %v3501_v9 = vld [vmem:[#allocation2 + $0x6a] sm:$0xff] }
  0x89   : > { %1685 = vmatpush.msra.mxu3 %v1191_v51  ;;  %1555 = vmatpush.msra.mxu1 %v1159_v53  ;;  %v1201_v48 = vld [vmem:[#allocation4 + $0x400] sm:$0xff] }
  0x8a   : > { %1621 = vmatpush.msra.mxu2 %v1174_v56  ;;  %1750 = vmatpush.msra.mxu0 %v1207_v58  ;;  %v3556_v52 = vld [vmem:[#allocation2 + $0xa9] sm:$0xff] }
  0x8b   : > { %1379 = vmatmul.f32.gmra.mxu2 %v3459_v41  ;;  %1686 = vmatpush.msra.mxu3 %v1190_v57  ;;  %v1836_v57 = vld [vmem:[#allocation8 + $0x70] sm:$0xff]  ;;  %v3565_v58 = vld [vmem:[#allocation2 + $0xaa] sm:$0xff] }
  0x8c   : > { %1314 = vmatmul.f32.gmra.mxu1 %v3454_v36  ;;  %1622 = vmatpush.msra.mxu2 %v1173_v62  ;;  %v3598_v37 = vld [vmem:[#allocation2 + $0xc9] sm:$0xff] }
  0x8d   : > { %1556 = vmatpush.msra.mxu1 %v1158_v59  ;;  %1751 = vmatpush.msra.mxu0 %v1206_v0  ;;  %v3567_v59 = vld [vmem:[#allocation6] ss:$0 sm:$0xff] }
  0x8e   : > { %1444 = vmatmul.f32.gmra.mxu3 %v3388_v19  ;;  %1506 = vmatmul.f32.gmra.mxu0 %v3462_v42 }
  0x8f   : > { %1557 = vmatpush.msra.mxu1 %v1157_v1  ;;  %1623 = vmatpush.msra.mxu2 %v1172_v3 }
  0x90   : > { %1752 = vmatpush.msra.mxu0 %v1205_v5 }
  0x91   : > { %1558 = vmatpush.msra.mxu1 %v1156_v8  ;;  %1624 = vmatpush.msra.mxu2 %v1171_v13 }
  0x92   : > { %1753 = vmatpush.msra.mxu0 %v1204_v15 }
  0x93   : > { %1382 = vmatmul.f32.gmra.mxu2 %v3467_v46  ;;  %1559 = vmatpush.msra.mxu1 %v1155_v18  ;;  %v833_v18 = vld [vmem:[#allocation2 + $0x30] sm:$0xff] }
  0x94   : > { %1317 = vmatmul.f32.gmra.mxu1 %v3462_v42  ;;  %1625 = vmatpush.msra.mxu2 %v1170_v50 }
  0x95   : > { %1754 = vmatpush.msra.mxu0 %v1203_v26  ;;  %1560 = vmatpush.msra.mxu1 %v1154_v27  ;;  %v1835_v26 = vld [vmem:[#allocation8 + $0x68] sm:$0xff] }
  0x96   : > { %1447 = vmatmul.f32.gmra.mxu3 %v3405_v29  ;;  %1509 = vmatmul.f32.gmra.mxu0 %v3470_v47 }
  0x97   : > { %1755 = vmatpush.msra.mxu0 %v1202_v38  ;;  %1561 = vmatpush.msra.mxu1 %v1153_v39 }
  0x99   : > { %1756 = vmatpush.msra.mxu0 %v1201_v48  ;;  %1901 = vmatpush.msrb.mxu1 %v1836_v57 }
  0x9b   : > { %1385 = vmatmul.f32.gmra.mxu2 %v3476_v54 }
  0x9c   : > { %1320 = vmatmul.f32.gmra.mxu1 %v3470_v47 }
  0x9e   : > { %1450 = vmatmul.f32.gmra.mxu3 %v3355_v6  ;;  %1512 = vmatmul.f32.gmra.mxu0 %v3479_v55  ;;  %v1189_v6 = vld [vmem:[#allocation4 + $0x3a0] sm:$0xff] }
  0x9f   : > { %1687 = vmatpush.msra.mxu3 %v1189_v6 }
  0xa3   : > { %1388 = vmatmul.f32.gmra.mxu2 %v3484_v60 }
  0xa4   : > { %1323 = vmatmul.f32.gmra.mxu1 %v3479_v55 }
  0xa6   : > { %1453 = vmatmul.f32.gmra.mxu3 %v3375_v12  ;;  %1515 = vmatmul.f32.gmra.mxu0 %v3487_v61  ;;  %v1188_v12 = vld [vmem:[#allocation4 + $0x398] sm:$0xff] }
  0xa7   : > { %1688 = vmatpush.msra.mxu3 %v1188_v12 }
  0xa9   : > { %1689 = vmatpush.msra.mxu3 %v1187_v14  ;;  %v1834_v14 = vld [vmem:[#allocation8 + $0x60] sm:$0xff] }
  0xaa   : > { %1902 = vmatpush.msrb.mxu1 %v1834_v14  ;;  %v1832_v14 = vld [vmem:[#allocation8 + $0x50] sm:$0xff] }
  0xab   : > { %1391 = vmatmul.f32.gmra.mxu2 %v3493_v33  ;;  %1690 = vmatpush.msra.mxu3 %v1186_v24 }
  0xac   : > { %1326 = vmatmul.f32.gmra.mxu1 %v3487_v61 }
  0xad   : > { %1691 = vmatpush.msra.mxu3 %v1185_v4  ;;  %1903 = vmatpush.msrb.mxu1 %v1832_v14 }
  0xae   : > { %1456 = vmatmul.f32.gmra.mxu3 %v3392_v21  ;;  %1518 = vmatmul.f32.gmra.mxu0 %v3496_v2  ;;  %v600_v21 = vld [vmem:[%s3345_s20 + $0xa0] sm:$0x3] }
  0xaf   : > { %625 = vst [vmem:[#allocation2 + $0xb8] sm:$0x3] %v600_v21 }
  0xb3   : > { %1394 = vmatmul.f32.gmra.mxu2 %v3501_v9 }
  0xb4   : > { %1329 = vmatmul.f32.gmra.mxu1 %v3496_v2 }
  0xb6   : > { %1459 = vmatmul.f32.gmra.mxu3 %v3409_v31  ;;  %1521 = vmatmul.f32.gmra.mxu0 %v3504_v10  ;;  %v3517_v31 = vld [vmem:[%s3345_s20 + $0xa8] sm:$0xff]  ;;  %v3570_v6 = vld [vmem:[#allocation2 + $0xb1] sm:$0xff] }
  0xb7   : > { %626 = vst [vmem:[#allocation2 + $0xc0] sm:$0xff] %v3517_v31  ;;  %v3583_v12 = vld [vmem:[#allocation2 + $0xb2] sm:$0xff] }
  0xbb   : > { %1397 = vmatmul.f32.gmra.mxu2 %v3510_v20 }
  0xbc   : > { %1332 = vmatmul.f32.gmra.mxu1 %v3504_v10 }
  0xbe   : > { %1462 = vmatmul.f32.gmra.mxu3 %v3359_v7  ;;  %1524 = vmatmul.f32.gmra.mxu0 %v3513_v22  ;;  %v1169_v7 = vld [vmem:[#allocation4 + $0x300] sm:$0xff]  ;;  %v3586_v8 = vld [vmem:[#allocation2 + $0xc1] sm:$0xff] }
  0xbf   : > { %1626 = vmatpush.msra.mxu2 %v1169_v7 }
  0xc1   : > { %1966 = vmatpush.msrb.mxu2 %v1837_v63 }
  0xc3   : > { %1400 = vmatmul.f32.gmra.mxu2 %v3526_v28  ;;  %v3531_v32 = vpop.f32.mrf.mxu1 }
  0xc4   : > { %1335 = vmatmul.f32.gmra.mxu1 %v3513_v22  ;;  %1967 = vmatpush.msrb.mxu2 %v1835_v26 }
  0xc6   : > { %1465 = vmatmul.f32.gmra.mxu3 %v3383_v16  ;;  %1527 = vmatmul.f32.gmra.mxu0 %v3529_v30 }
  0xc9   : > { %v3539_v43 = vpop.f32.mrf.mxu2  ;;  %v1238_v45 = vpop.f32.mrf.mxu0 }
  0xca   : > { %v1239_v27 = vadd.f32 %v3567_v59, %v1238_v45 }
  0xcb   : > { %1403 = vmatmul.f32.gmra.mxu2 %v3537_v40  ;;  %v3544_v44 = vpop.f32.mrf.mxu3 }
  0xcc   : > { %1338 = vmatmul.f32.gmra.mxu1 %v3529_v30  ;;  %v3547_v16 = vpop.f32.mrf.mxu1 }
  0xce   : > { %1468 = vmatmul.f32.gmra.mxu3 %v3400_v25  ;;  %1530 = vmatmul.f32.gmra.mxu0 %v3542_v11 }
  0xd1   : > { %v3553_v51 = vpop.f32.mrf.mxu2 }
  0xd3   : > { %1406 = vmatmul.f32.gmra.mxu2 %v3551_v49 }
  0xd4   : > { %1341 = vmatmul.f32.gmra.mxu1 %v3542_v11  ;;  %v3559_v53 = vpop.f32.mrf.mxu3 }
  0xd5   : > { %v3561_v56 = vpop.f32.mrf.mxu1 }
  0xd6   : > { %1471 = vmatmul.f32.gmra.mxu3 %v3417_v35  ;;  %1533 = vmatmul.f32.gmra.mxu0 %v3556_v52 }
  0xd7   : > { %v1241_v25 = vpop.f32.mrf.mxu0 }
  0xd8   : > { %v1242_v45 = vadd.f32 %v3567_v59, %v1241_v25  ;;  %v1833_v25 = vld [vmem:[#allocation8 + $0x58] sm:$0xff] }
  0xd9   : > { %1968 = vmatpush.msrb.mxu2 %v1833_v25 }
  0xda   : > { %v1268_v62 = vpop.f32.mrf.mxu2 }
  0xdb   : > { %1409 = vmatmul.f32.gmra.mxu2 %v3565_v58  ;;  %v3573_v0 = vadd.f32 %v3567_v59, %v1268_v62 }
  0xdc   : > { %1344 = vmatmul.f32.gmra.mxu1 %v3556_v52 }
  0xde   : > { %1474 = vmatmul.f32.gmra.mxu3 %v3517_v31  ;;  %1536 = vmatmul.f32.gmra.mxu0 %v3570_v6  ;;  %v1280_v35 = vpop.f32.mrf.mxu3 }
  0xdf   : > { %v3578_v1 = vpop.f32.mrf.mxu1  ;;  %v3581_v3 = vadd.f32 %v3567_v59, %v1280_v35  ;;  %v3007_v35 = vld [vmem:[#allocation2 + $0x38] sm:$0xff] }
  0xe1   : > { %v1244_v5 = vpop.f32.mrf.mxu0 }
  0xe2   : > { %v1245_v26 = vadd.f32 %v3567_v59, %v1244_v5 }
  0xe3   : > { %1412 = vmatmul.f32.gmra.mxu2 %v3583_v12 }
  0xe4   : > { %1347 = vmatmul.f32.gmra.mxu1 %v3570_v6  ;;  %v1271_v13 = vpop.f32.mrf.mxu2 }
  0xe5   : > { %v3590_v21 = vadd.f32 %v3567_v59, %v1271_v13 }
  0xe6   : > { %1477 = vmatmul.f32.gmra.mxu3 %v3521_v23  ;;  %1539 = vmatmul.f32.gmra.mxu0 %v3586_v8 }
  0xe8   : > { %v1283_v15 = vpop.f32.mrf.mxu3 }
  0xe9   : > { %v3595_v50 = vadd.f32 %v3567_v59, %v1283_v15  ;;  %v1303_v24 = vpop.f32.mrf.mxu1 }
  0xea   : > { %v1304_v4 = vadd.f32 %v1303_v24, %v1239_v27 }
  0xeb   : > { %4088 = vst [vmem:[#allocation14_spill] sm:$0xff] %v3595_v50  ;;  %v1247_v7 = vpop.f32.mrf.mxu0  ;;  %1627 = vmatmul.f32.vlgmr.msra.gmra.mxu2 %v833_v18  ;;  %v2067_v50 = vld [vmem:[%s4076_s7 + $0x60] sm:$0xff] }
  0xec   : > { %1562 = vmatmul.f32.vlgmr.msra.gmra.mxu1 %v3447_v17  ;;  %v1248_v5 = vadd.f32 %v3567_v59, %v1247_v7  ;;  %v1831_v7 = vld [vmem:[#allocation8 + $0x48] sm:$0xff] }
  0xed   : > { %1969 = vmatpush.msrb.mxu2 %v1831_v7 }
  0xee   : > { %1542 = vmatmul.f32.gmra.mxu0 %v3598_v37  ;;  %1692 = vmatmul.f32.vlgmr.msra.gmra.mxu3 %v3454_v36  ;;  %v1368_v38 = vpop.f32.mrf.mxu2 }
  0xef   : > { %v1369_v39 = vadd.f32 %v1368_v38, %v1304_v4 }
  0xf1   : > { %v1306_v48 = vpop.f32.mrf.mxu1  ;;  %v1433_v57 = vpop.f32.mrf.mxu3 }
  0xf2   : > { %v3603_v62 = vadd.f32 %v1433_v57, %v1369_v39  ;;  %v1307_v17 = vadd.f32 %v1306_v48, %v1242_v45  ;;  %v1830_v45 = vld [vmem:[#allocation8 + $0x40] sm:$0xff] }
  0xf3   : > { %v3606_v63 = vpop.f32.mrf.mxu0  ;;  %1630 = vmatmul.f32.gmra.mxu2 %v3007_v35  ;;  %v837_v35 = vld [vmem:[#allocation2 + $0x60] sm:$0xff]  ;;  %1904 = vmatpush.msrb.mxu1 %v1830_v45 }
  0xf4   : > { %1565 = vmatmul.f32.gmra.mxu1 %v3451_v34 }
  0xf6   : > { %1695 = vmatmul.f32.gmra.mxu3 %v3462_v42  ;;  %1757 = vmatmul.f32.vlgmr.msra.gmra.mxu0 %v3459_v41  ;;  %v1371_v36 = vpop.f32.mrf.mxu2 }
  0xf7   : > { %v1372_v13 = vadd.f32 %v1371_v36, %v1307_v17 }
  0xf9   : > { %v1309_v15 = vpop.f32.mrf.mxu1  ;;  %v1436_v18 = vpop.f32.mrf.mxu3 }
  0xfa   : > { %v3611_v24 = vadd.f32 %v1436_v18, %v1372_v13  ;;  %v1310_v34 = vadd.f32 %v1309_v15, %v1245_v26  ;;  %v838_v18 = vld [vmem:[#allocation2 + $0x68] sm:$0xff] }
  0xfb   : > { %v3614_v27 = vpop.f32.mrf.mxu0  ;;  %1633 = vmatmul.f32.gmra.mxu2 %v3388_v19 }
  0xfc   : > { %1568 = vmatmul.f32.gmra.mxu1 %v3459_v41 }
  0xfe   : > { %1698 = vmatmul.f32.gmra.mxu3 %v3470_v47  ;;  %1760 = vmatmul.f32.gmra.mxu0 %v3467_v46  ;;  %v1374_v42 = vpop.f32.mrf.mxu2 }
  0xff   : > { %v1375_v4 = vadd.f32 %v1374_v42, %v1310_v34 }
 0x101   : > { %v1312_v38 = vpop.f32.mrf.mxu1  ;;  %v1439_v39 = vpop.f32.mrf.mxu3 }
 0x102   : > { %v3620_v48 = vadd.f32 %v1439_v39, %v1375_v4  ;;  %v1313_v19 = vadd.f32 %v1312_v38, %v1248_v5  ;;  %v1828_v38 = vld [vmem:[#allocation8 + $0x30] sm:$0xff]  ;;  %v839_v39 = vld [vmem:[#allocation2 + $0x78] sm:$0xff] }
 0x103   : > { %v3623_v57 = vpop.f32.mrf.mxu0  ;;  %1636 = vmatmul.f32.gmra.mxu2 %v3405_v29  ;;  %v1251_v29 = vadd.f32 %v3567_v59, %v3531_v32  ;;  %v1254_v32 = vadd.f32 %v3567_v59, %v3547_v16  ;;  %1905 = vmatpush.msrb.mxu1 %v1828_v38  ;;  %v1829_v16 = vld [vmem:[#allocation8 + $0x38] sm:$0xff] }
 0x104   : > { %1571 = vmatmul.f32.gmra.mxu1 %v3467_v46  ;;  %1970 = vmatpush.msrb.mxu2 %v1829_v16 }
 0x106   : > { %1701 = vmatmul.f32.gmra.mxu3 %v3479_v55  ;;  %1763 = vmatmul.f32.gmra.mxu0 %v3476_v54  ;;  %v1377_v41 = vpop.f32.mrf.mxu2 }
 0x107   : > { %v1378_v47 = vadd.f32 %v1377_v41, %v1313_v19 }
 0x109   : > { %v1315_v17 = vpop.f32.mrf.mxu1  ;;  %v1442_v36 = vpop.f32.mrf.mxu3 }
 0x10a   : > { %v3629_v13 = vadd.f32 %v1442_v36, %v1378_v47  ;;  %v1316_v46 = vadd.f32 %v1315_v17, %v1251_v29  ;;  %v3008_v29 = vld [vmem:[#allocation2 + $0x80] sm:$0xff] }
 0x10b   : > { %v3633_v14 = vpop.f32.mrf.mxu0  ;;  %1639 = vmatmul.f32.gmra.mxu2 %v837_v35 }
 0x10c   : > { %1574 = vmatmul.f32.gmra.mxu1 %v3476_v54 }
 0x10e   : > { %1704 = vmatmul.f32.gmra.mxu3 %v3487_v61  ;;  %1766 = vmatmul.f32.gmra.mxu0 %v3484_v60  ;;  %v1380_v55 = vpop.f32.mrf.mxu2 }
 0x10f   : > { %v1381_v15 = vadd.f32 %v1380_v55, %v1316_v46 }
 0x111   : > { %v1318_v25 = vpop.f32.mrf.mxu1  ;;  %v1445_v26 = vpop.f32.mrf.mxu3 }
 0x112   : > { %v3638_v34 = vadd.f32 %v1445_v26, %v1381_v15  ;;  %v1319_v54 = vadd.f32 %v1318_v25, %v1254_v32  ;;  %v1826_v15 = vld [vmem:[#allocation8 + $0x20] sm:$0xff]  ;;  %v1827_v32 = vld [vmem:[#allocation8 + $0x28] sm:$0xff] }
 0x113   : > { %v3642_v42 = vpop.f32.mrf.mxu0  ;;  %1642 = vmatmul.f32.gmra.mxu2 %v838_v18  ;;  %v841_v18 = vld [vmem:[#allocation2 + $0x90] sm:$0xff]  ;;  %1906 = vmatpush.msrb.mxu1 %v1826_v15 }
 0x114   : > { %1577 = vmatmul.f32.gmra.mxu1 %v3484_v60  ;;  %v1257_v60 = vadd.f32 %v3567_v59, %v3561_v56  ;;  %1971 = vmatpush.msrb.mxu2 %v1827_v32 }
 0x116   : > { %1707 = vmatmul.f32.gmra.mxu3 %v3496_v2  ;;  %1769 = vmatmul.f32.gmra.mxu0 %v3493_v33  ;;  %v1383_v61 = vpop.f32.mrf.mxu2 }
 0x117   : > { %v1384_v4 = vadd.f32 %v1383_v61, %v1319_v54  ;;  %v842_v54 = vld [vmem:[#allocation2 + $0x98] sm:$0xff] }
 0x119   : > { %v1321_v5 = vpop.f32.mrf.mxu1  ;;  %v1448_v19 = vpop.f32.mrf.mxu3 }
 0x11a   : > { %v3648_v41 = vadd.f32 %v1448_v19, %v1384_v4  ;;  %v1322_v47 = vadd.f32 %v1321_v5, %v1257_v60  ;;  %v1824_v60 = vld [vmem:[#allocation8 + $0x10] sm:$0xff] }
 0x11b   : > { %v3656_v2 = vpop.f32.mrf.mxu0  ;;  %1645 = vmatmul.f32.gmra.mxu2 %v839_v39  ;;  %v632_v39 = vstv %s569_s30  ;;  %1907 = vmatpush.msrb.mxu1 %v1824_v60 }
 0x11c   : > { %1580 = vmatmul.f32.gmra.mxu1 %v3493_v33  ;;  %v1260_v33 = vadd.f32 %v3567_v59, %v3578_v1 }
 0x11e   : > { %1710 = vmatmul.f32.gmra.mxu3 %v3504_v10  ;;  %1772 = vmatmul.f32.gmra.mxu0 %v3501_v9  ;;  %v1386_v45 = vpop.f32.mrf.mxu2 }
 0x11f   : > { %v1387_v35 = vadd.f32 %v1386_v45, %v1322_v47  ;;  %v843_v47 = vld [vmem:[#allocation2 + $0xa8] sm:$0xff] }
 0x121   : > { %v1324_v17 = vpop.f32.mrf.mxu1  ;;  %v1451_v36 = vpop.f32.mrf.mxu3 }
 0x122   : > { %v3663_v7 = vadd.f32 %v1451_v36, %v1387_v35  ;;  %v1325_v10 = vadd.f32 %v1324_v17, %v1260_v33  ;;  %v631_v36 = vld [vmem:[%s548_s18 + $0x10] sm:$0x3] }
 0x123   : > { %v3669_v56 = vpop.f32.mrf.mxu0  ;;  %1648 = vmatmul.f32.gmra.mxu2 %v3008_v29  ;;  %v844_v29 = vld [vmem:[#allocation2 + $0xb0] sm:$0xff] }
 0x124   : > { %1583 = vmatmul.f32.gmra.mxu1 %v3501_v9 }
 0x126   : > { %1713 = vmatmul.f32.gmra.mxu3 %v3513_v22  ;;  %1775 = vmatmul.f32.gmra.mxu0 %v3510_v20  ;;  %v1389_v46 = vpop.f32.mrf.mxu2 }
 0x127   : > { %v1390_v55 = vadd.f32 %v1389_v46, %v1325_v10 }
 0x129   : > { %v3675_v1 = vpop.f32.mrf.mxu1  ;;  %v1454_v25 = vpop.f32.mrf.mxu3 }
 0x12a   : > { %v3677_v26 = vadd.f32 %v1454_v25, %v1390_v55  ;;  %v1823_v25 = vld [vmem:[#allocation8 + $0x8] sm:$0xff] }
 0x12b   : > { %v3680_v9 = vpop.f32.mrf.mxu0  ;;  %1651 = vmatmul.f32.gmra.mxu2 %v841_v18 }
 0x12c   : > { %1586 = vmatmul.f32.gmra.mxu1 %v3510_v20  ;;  %v629_v20 = vld [vmem:[%s548_s18] sm:$0xff] }
 0x12d   : > { %v633_v5 = vmul.f32 %v632_v39, %v629_v20 }
 0x12e   : > { %1716 = vmatmul.f32.gmra.mxu3 %v3529_v30  ;;  %1778 = vmatmul.f32.gmra.mxu0 %v3526_v28  ;;  %v3685_v22 = vpop.f32.mrf.mxu2  ;;  %v630_v30 = vld [vmem:[%s548_s18 + $0x8] sm:$0xff]  ;;  %s2760_s18 = sshll.u32 %s4110_s10, 5 }
 0x12f   : > { %v3697_v19 = vmul.f32 %v632_v39, %v630_v30  ;;  %637 = vst [vmem:[#allocation2 + $0xd8] sm:$0xff] %v633_v5  ;;  %v2070_v30 = vld [vmem:[%s4076_s7 + $0x78] sm:$0xff]  ;;  %s560_s25 = sadd.s32 %s2760_s18, %s2759_s21 }
 0x130   : > { %2091 = vmatpush.msrb.mxu3 %v2070_v30  ;;  %s2761_s26 = sshll.u32 %s560_s25, 3 }
 0x131   : > { %v3690_v61 = vpop.f32.mrf.mxu1  ;;  %v3692_v4 = vpop.f32.mrf.mxu3  ;;  %638 = vst [vmem:[#allocation2 + $0xe0] sm:$0xff] %v3697_v19  ;;  %s4008_s28 = scalar_lea.vmem %s4078_s9, %s2761_s26 }
 0x133   : > { %v3694_v38 = vpop.f32.mrf.mxu0  ;;  %1654 = vmatmul.f32.gmra.mxu2 %v842_v54 }
 0x134   : > { %1589 = vmatmul.f32.gmra.mxu1 %v3526_v28  ;;  %v1825_v28 = vld [vmem:[#allocation8 + $0x18] sm:$0xff] }
 0x135   : > { %1972 = vmatpush.msrb.mxu2 %v1825_v28 }
 0x136   : > { %1719 = vmatmul.f32.gmra.mxu3 %v3542_v11  ;;  %1781 = vmatmul.f32.gmra.mxu0 %v3537_v40  ;;  %v3701_v16 = vpop.f32.mrf.mxu2  ;;  %v635_v11 = vmul.f32 %v632_v39, %v631_v36  ;;  %v909_v39 = vld [vmem:[#allocation2 + $0xc2] sm:$0xff]  ;;  %v2069_v36 = vld [vmem:[%s4076_s7 + $0x70] sm:$0xff] }
 0x137   : > { %1973 = vmatpush.msrb.mxu2 %v1823_v25  ;;  %2092 = vmatpush.msrb.mxu3 %v2069_v36  ;;  %v1499_v36 = vadd.f32 %v3606_v63, %v3603_v62  ;;  %v2084_v62 = vld [vmem:[%s4076_s7 + $0xe8] sm:$0xff]  ;;  %v1502_v63 = vadd.f32 %v3614_v27, %v3611_v24  ;;  %v2066_v24 = vld [vmem:[%s4076_s7 + $0x58] sm:$0xff]  ;;  %v1505_v27 = vadd.f32 %v3623_v57, %v3620_v48 }
 0x138   : > { %639 = vst [vmem:[#allocation2 + $0xe8] sm:$0x3] %v635_v11  ;;  %v2082_v48 = vld [vmem:[%s4076_s7 + $0xd8] sm:$0xff]  ;;  %v1508_v57 = vadd.f32 %v3633_v14, %v3629_v13  ;;  %v2081_v13 = vld [vmem:[%s4076_s7 + $0xd0] sm:$0xff]  ;;  %v1511_v14 = vadd.f32 %v3642_v42, %v3638_v34  ;;  %v2080_v34 = vld [vmem:[%s4076_s7 + $0xc8] sm:$0xff]  ;;  %v1514_v42 = vadd.f32 %v3656_v2, %v3648_v41  ;;  %v1517_v2 = vadd.f32 %v3669_v56, %v3663_v7 }
 0x139   : > { %v3704_v45 = vpop.f32.mrf.mxu1  ;;  %v3706_v35 = vpop.f32.mrf.mxu3  ;;  %v2079_v41 = vld [vmem:[%s4076_s7 + $0xc0] sm:$0xff]  ;;  %v2061_v56 = vld [vmem:[%s4076_s7 + $0x30] sm:$0xff] }
 0x13b   : > { %v3708_v17 = vpop.f32.mrf.mxu0  ;;  %1657 = vmatmul.f32.gmra.mxu2 %v843_v47  ;;  %v910_v47 = vld [vmem:[#allocation2 + $0xca] sm:$0xff] }
 0x13c   : > { %1592 = vmatmul.f32.gmra.mxu1 %v3537_v40 }
 0x13e   : > { %1722 = vmatmul.f32.gmra.mxu3 %v3556_v52  ;;  %1784 = vmatmul.f32.gmra.mxu0 %v3551_v49  ;;  %v3713_v33 = vpop.f32.mrf.mxu2  ;;  %v1822_v52 = vld [vmem:[#allocation8] sm:$0xff] }
 0x13f   : > { %1908 = vmatpush.msrb.mxu1 %v1822_v52  ;;  %v911_v52 = vld [vmem:[#allocation2 + $0xda] sm:$0xff] }
 0x141   : > { %v3715_v10 = vpop.f32.mrf.mxu1  ;;  %v3717_v46 = vpop.f32.mrf.mxu3 }
 0x143   : > { %v3719_v55 = vpop.f32.mrf.mxu0  ;;  %1660 = vmatmul.f32.gmra.mxu2 %v844_v29  ;;  %v880_v29 = vld [vmem:[#allocation2 + $0xe1] sm:$0xff] }
 0x144   : > { %1595 = vmatmul.f32.gmra.mxu1 %v3551_v49 }
 0x146   : > { %1725 = vmatmul.f32.gmra.mxu3 %v3570_v6  ;;  %1787 = vmatmul.f32.gmra.mxu0 %v3565_v58  ;;  %v3724_v40 = vpop.f32.mrf.mxu2 }
 0x149   : > { %v3726_v15 = vpop.f32.mrf.mxu1  ;;  %v3728_v18 = vpop.f32.mrf.mxu3 }
 0x14b   : > { %v3730_v32 = vpop.f32.mrf.mxu0  ;;  %1663 = vmatmul.f32.gmra.mxu2 %v3517_v31 }
 0x14c   : > { %1598 = vmatmul.f32.gmra.mxu1 %v3565_v58 }
 0x14e   : > { %1728 = vmatmul.f32.gmra.mxu3 %v3586_v8  ;;  %1790 = vmatmul.f32.gmra.mxu0 %v3583_v12  ;;  %v3736_v49 = vpop.f32.mrf.mxu2 }
 0x151   : > { %v3738_v6 = vpop.f32.mrf.mxu1  ;;  %v3740_v54 = vpop.f32.mrf.mxu3 }
 0x153   : > { %v3742_v20 = vpop.f32.mrf.mxu0  ;;  %1666 = vmatmul.f32.gmra.mxu2 %v3521_v23  ;;  %v879_v23 = vld [vmem:[#allocation2 + $0xd9] sm:$0xff] }
 0x154   : > { %1601 = vmatmul.f32.gmra.mxu1 %v3583_v12 }
 0x156   : > { %1731 = vmatmul.f32.gmra.mxu3 %v3598_v37  ;;  %1793 = vmatmul.f32.gmra.mxu0 %v909_v39  ;;  %v3747_v31 = vpop.f32.mrf.mxu2 }
 0x159   : > { %v3749_v58 = vpop.f32.mrf.mxu1  ;;  %v3751_v8 = vpop.f32.mrf.mxu3 }
 0x15b   : > { %v3756_v60 = vpop.f32.mrf.mxu0  ;;  %1669 = vmatmul.f32.gmra.mxu2 %v633_v5  ;;  %v2086_v5 = vld [vmem:[%s4076_s7 + $0xf8] sm:$0xff] }
 0x15c   : > { %1604 = vmatmul.f32.gmra.mxu1 %v909_v39  ;;  %2156 = vmatpush.msrb.mxu0 %v2086_v5  ;;  %v912_v5 = vld [vmem:[#allocation2 + $0xe2] sm:$0xff] }
 0x15e   : > { %1734 = vmatmul.f32.gmra.mxu3 %v879_v23  ;;  %1796 = vmatmul.f32.gmra.mxu0 %v910_v47  ;;  %v3758_v12 = vpop.f32.mrf.mxu2  ;;  %v2068_v23 = vld [vmem:[%s4076_s7 + $0x68] sm:$0xff] }
 0x15f   : > { %2093 = vmatpush.msrb.mxu3 %v2068_v23 }
 0x161   : > { %v3760_v37 = vpop.f32.mrf.mxu1  ;;  %v3762_v28 = vpop.f32.mrf.mxu3  ;;  %2094 = vmatpush.msrb.mxu3 %v2067_v50  ;;  %v2083_v50 = vld [vmem:[%s4076_s7 + $0xe0] sm:$0xff] }
 0x162   : > { %4090 = vst [vmem:[#allocation15_spill] sm:$0xff] %v3760_v37 }
 0x163   : > { %v3770_v11 = vpop.f32.mrf.mxu0  ;;  %1672 = vmatmul.f32.gmra.mxu2 %v3697_v19  ;;  %v2085_v19 = vld [vmem:[%s4076_s7 + $0xf0] sm:$0xff]  ;;  %2095 = vmatpush.msrb.mxu3 %v2066_v24 }
 0x164   : > { %4091 = vst [vmem:[#allocation16_spill] sm:$0xff] %v3770_v11  ;;  %1607 = vmatmul.f32.gmra.mxu1 %v910_v47  ;;  %2157 = vmatpush.msrb.mxu0 %v2085_v19 }
 0x166   : > { %1737 = vmatmul.f32.gmra.mxu3 %v880_v29  ;;  %1799 = vmatmul.f32.gmra.mxu0 %v911_v52  ;;  %v3773_v25 = vpop.f32.mrf.mxu2 }
 0x167   : > { %4092 = vst [vmem:[#allocation17_spill] sm:$0xff] %v3773_v25  ;;  %2158 = vmatpush.msrb.mxu0 %v2084_v62 }
 0x169   : > { %v3775_v39 = vpop.f32.mrf.mxu3  ;;  %v1563_v30 = vpop.f32.mrf.mxu1  ;;  %2159 = vmatpush.msrb.mxu0 %v2083_v50 }
 0x16a   : > { %4093 = vst [vmem:[#allocation18_spill] sm:$0xff] %v3775_v39  ;;  %v1564_v29 = vadd.f32 %v1563_v30, %v1499_v36 }
 0x16b   : > { %v3785_v47 = vpop.f32.mrf.mxu0  ;;  %2160 = vmatpush.msrb.mxu0 %v2082_v48 }
 0x16d   : > { %2161 = vmatpush.msrb.mxu0 %v2081_v13 }
 0x16e   : > { %1802 = vmatmul.f32.gmra.mxu0 %v912_v5  ;;  %v1628_v52 = vpop.f32.mrf.mxu2 }
 0x16f   : > { %v1629_v39 = vadd.f32 %v1628_v52, %v1564_v29  ;;  %2162 = vmatpush.msrb.mxu0 %v2080_v34  ;;  %v2078_v34 = vld [vmem:[%s4076_s7 + $0xb8] sm:$0xff] }
 0x171   : > { %v1566_v25 = vpop.f32.mrf.mxu1  ;;  %v1693_v11 = vpop.f32.mrf.mxu3  ;;  %2163 = vmatpush.msrb.mxu0 %v2079_v41 }
 0x172   : > { %v1694_v37 = vadd.f32 %v1693_v11, %v1629_v39  ;;  %v1567_v19 = vadd.f32 %v1566_v25, %v1502_v63 }
 0x173   : > { %v1758_v23 = vpop.f32.mrf.mxu0  ;;  %2164 = vmatpush.msrb.mxu0 %v2078_v34 }
 0x174   : > { %v1759_v30 = vadd.f32 %v1758_v23, %v1694_v37 }
 0x176   : > { %v1806_v36 = vmax.f32 %v1759_v30, 0.0  ;;  %v1631_v5 = vpop.f32.mrf.mxu2 }
 0x177   : > { %v1632_v11 = vadd.f32 %v1631_v5, %v1567_v19 }
 0x178   : > { %2762 = vmatmul.msk.f32.vlgmr.msrb.gmra.mxu1 %vm1844_vm0, %v1806_v36  ;;  %2778 = vmatmul.msk.f32.vlgmr.msrb.gmra.mxu2 %vm1844_vm0, %v1806_v36 }
 0x179   : > { %v1569_v39 = vpop.f32.mrf.mxu1  ;;  %v1696_v29 = vpop.f32.mrf.mxu3 }
 0x17a   : > { %v1697_v52 = vadd.f32 %v1696_v29, %v1632_v11  ;;  %v1570_v62 = vadd.f32 %v1569_v39, %v1505_v27  ;;  %v2065_v11 = vld [vmem:[%s4076_s7 + $0x50] sm:$0xff] }
 0x17b   : > { %v1761_v37 = vpop.f32.mrf.mxu0  ;;  %2096 = vmatpush.msrb.mxu3 %v2065_v11 }
 0x17c   : > { %v1762_v25 = vadd.f32 %v1761_v37, %v1697_v52 }
 0x17e   : > { %v1807_v63 = vmax.f32 %v1762_v25, 0.0  ;;  %v1634_v23 = vpop.f32.mrf.mxu2 }
 0x17f   : > { %v1635_v30 = vadd.f32 %v1634_v23, %v1570_v62 }
 0x180   : > { %2763 = vmatmul.msk.f32.gmra.mxu1 %vm1844_vm0, %v1807_v63  ;;  %2779 = vmatmul.msk.f32.gmra.mxu2 %vm1844_vm0, %v1807_v63  ;;  %v2064_v63 = vld [vmem:[%s4076_s7 + $0x48] sm:$0xff] }
 0x181   : > { %v1572_v19 = vpop.f32.mrf.mxu1  ;;  %v1699_v36 = vpop.f32.mrf.mxu3  ;;  %2097 = vmatpush.msrb.mxu3 %v2064_v63 }
 0x182   : > { %v1700_v5 = vadd.f32 %v1699_v36, %v1635_v30  ;;  %v1573_v52 = vadd.f32 %v1572_v19, %v1508_v57 }
 0x183   : > { %v1764_v39 = vpop.f32.mrf.mxu0 }
 0x184   : > { %v1765_v29 = vadd.f32 %v1764_v39, %v1700_v5 }
 0x186   : > { %v1808_v24 = vmax.f32 %v1765_v29, 0.0  ;;  %v1637_v50 = vpop.f32.mrf.mxu2  ;;  %v2063_v29 = vld [vmem:[%s4076_s7 + $0x40] sm:$0xff] }
 0x187   : > { %v1638_v27 = vadd.f32 %v1637_v50, %v1573_v52  ;;  %2098 = vmatpush.msrb.mxu3 %v2063_v29 }
 0x188   : > { %2764 = vmatmul.msk.f32.gmra.mxu1 %vm1844_vm0, %v1808_v24  ;;  %2780 = vmatmul.msk.f32.gmra.mxu2 %vm1844_vm0, %v1808_v24 }
 0x189   : > { %v1575_v37 = vpop.f32.mrf.mxu1  ;;  %v1702_v25 = vpop.f32.mrf.mxu3 }
 0x18a   : > { %v1703_v62 = vadd.f32 %v1702_v25, %v1638_v27  ;;  %v1576_v19 = vadd.f32 %v1575_v37, %v1511_v14  ;;  %v2062_v14 = vld [vmem:[%s4076_s7 + $0x38] sm:$0xff] }
 0x18b   : > { %v1767_v23 = vpop.f32.mrf.mxu0  ;;  %2099 = vmatpush.msrb.mxu3 %v2062_v14 }
 0x18c   : > { %v1768_v30 = vadd.f32 %v1767_v23, %v1703_v62 }
 0x18d   : > { %2100 = vmatpush.msrb.mxu3 %v2061_v56 }
 0x18e   : > { %v1809_v36 = vmax.f32 %v1768_v30, 0.0  ;;  %v1640_v5 = vpop.f32.mrf.mxu2 }
 0x18f   : > { %v1641_v11 = vadd.f32 %v1640_v5, %v1576_v19 }
 0x190   : > { %2765 = vmatmul.msk.f32.gmra.mxu1 %vm1844_vm0, %v1809_v36  ;;  %2781 = vmatmul.msk.f32.gmra.mxu2 %vm1844_vm0, %v1809_v36 }
 0x191   : > { %v1578_v48 = vpop.f32.mrf.mxu1  ;;  %v1705_v57 = vpop.f32.mrf.mxu3 }
 0x192   : > { %v1706_v39 = vadd.f32 %v1705_v57, %v1641_v11  ;;  %v1579_v50 = vadd.f32 %v1578_v48, %v1514_v42  ;;  %v1263_v11 = vadd.f32 %v3567_v59, %v3539_v43  ;;  %v1520_v43 = vadd.f32 %v3680_v9, %v3677_v26 }
 0x193   : > { %v1770_v52 = vpop.f32.mrf.mxu0 }
 0x194   : > { %v1771_v24 = vadd.f32 %v1770_v52, %v1706_v39  ;;  %v1328_v57 = vadd.f32 %v3675_v1, %v1263_v11 }
 0x196   : > { %v1810_v27 = vmax.f32 %v1771_v24, 0.0  ;;  %v1643_v37 = vpop.f32.mrf.mxu2  ;;  %v1393_v42 = vadd.f32 %v3685_v22, %v1328_v57  ;;  %v2076_v57 = vld [vmem:[%s4076_s7 + $0xa8] sm:$0xff] }
 0x197   : > { %v1644_v25 = vadd.f32 %v1643_v37, %v1579_v50  ;;  %v1266_v37 = vadd.f32 %v3567_v59, %v3553_v51  ;;  %v2077_v51 = vld [vmem:[%s4076_s7 + $0xb0] sm:$0xff] }
 0x198   : > { %2766 = vmatmul.msk.f32.gmra.mxu1 %vm1844_vm0, %v1810_v27  ;;  %2782 = vmatmul.msk.f32.gmra.mxu2 %vm1844_vm0, %v1810_v27 }
 0x199   : > { %v1581_v62 = vpop.f32.mrf.mxu1  ;;  %v1708_v63 = vpop.f32.mrf.mxu3  ;;  %v1331_v26 = vadd.f32 %v3690_v61, %v1266_v37  ;;  %2165 = vmatpush.msrb.mxu0 %v2077_v51 }
 0x19a   : > { %v1709_v13 = vadd.f32 %v1708_v63, %v1644_v25  ;;  %v1582_v19 = vadd.f32 %v1581_v62, %v1517_v2  ;;  %v1458_v25 = vadd.f32 %v3692_v4, %v1393_v42  ;;  %v1337_v42 = vadd.f32 %v3715_v10, %v3590_v21 }
 0x19b   : > { %v1773_v23 = vpop.f32.mrf.mxu0  ;;  %v1396_v14 = vadd.f32 %v3701_v16, %v1331_v26  ;;  %2166 = vmatpush.msrb.mxu0 %v2076_v57 }
 0x19c   : > { %v1774_v30 = vadd.f32 %v1773_v23, %v1709_v13  ;;  %v2060_v13 = vld [vmem:[%s4076_s7 + $0x28] sm:$0xff]  ;;  %v1523_v4 = vadd.f32 %v3694_v38, %v1458_v25 }
 0x19d   : > { %2101 = vmatpush.msrb.mxu3 %v2060_v13  ;;  %v2057_v13 = vld [vmem:[%s4076_s7 + $0x10] sm:$0xff] }
 0x19e   : > { %v1811_v36 = vmax.f32 %v1774_v30, 0.0  ;;  %v1646_v5 = vpop.f32.mrf.mxu2 }
 0x19f   : > { %v1647_v48 = vadd.f32 %v1646_v5, %v1582_v19  ;;  %v1461_v19 = vadd.f32 %v3706_v35, %v1396_v14  ;;  %v1334_v5 = vadd.f32 %v3704_v45, %v3573_v0 }
 0x1a0   : > { %2767 = vmatmul.msk.f32.gmra.mxu1 %vm1844_vm0, %v1811_v36  ;;  %2783 = vmatmul.msk.f32.gmra.mxu2 %vm1844_vm0, %v1811_v36 }
 0x1a1   : > { %v1584_v39 = vpop.f32.mrf.mxu1  ;;  %v1711_v29 = vpop.f32.mrf.mxu3  ;;  %v1526_v35 = vadd.f32 %v3708_v17, %v1461_v19 }
 0x1a2   : > { %v1712_v7 = vadd.f32 %v1711_v29, %v1647_v48  ;;  %v1585_v24 = vadd.f32 %v1584_v39, %v1520_v43  ;;  %v2059_v48 = vld [vmem:[%s4076_s7 + $0x20] sm:$0xff]  ;;  %v1399_v39 = vadd.f32 %v3713_v33, %v1334_v5  ;;  %v2056_v5 = vld [vmem:[%s4076_s7 + $0x8] sm:$0xff] }
 0x1a3   : > { %v1776_v52 = vpop.f32.mrf.mxu0  ;;  %2102 = vmatpush.msrb.mxu3 %v2059_v48 }
 0x1a4   : > { %v1777_v1 = vadd.f32 %v1776_v52, %v1712_v7  ;;  %v1464_v34 = vadd.f32 %v3717_v46, %v1399_v39  ;;  %v1346_v39 = vadd.f32 %v3749_v58, %v3581_v3  ;;  %v4094_v3 = vld [vmem:[#allocation14_spill] sm:$0xff]  ;;  %v4095_v58 = vld [vmem:[#allocation15_spill] sm:$0xff] }
 0x1a6   : > { %v1812_v50 = vmax.f32 %v1777_v1, 0.0  ;;  %v1649_v27 = vpop.f32.mrf.mxu2  ;;  %v2058_v1 = vld [vmem:[%s4076_s7 + $0x18] sm:$0xff]  ;;  %v1529_v46 = vadd.f32 %v3719_v55, %v1464_v34 }
 0x1a7   : > { %v1650_v62 = vadd.f32 %v1649_v27, %v1585_v24  ;;  %v2075_v24 = vld [vmem:[%s4076_s7 + $0xa0] sm:$0xff]  ;;  %2103 = vmatpush.msrb.mxu3 %v2058_v1  ;;  %v1349_v1 = vadd.f32 %v4095_v58, %v4094_v3 }
 0x1a8   : > { %2768 = vmatmul.msk.f32.gmra.mxu1 %vm1844_vm0, %v1812_v50  ;;  %2784 = vmatmul.msk.f32.gmra.mxu2 %vm1844_vm0, %v1812_v50  ;;  %v1402_v50 = vadd.f32 %v3724_v40, %v1337_v42 }
 0x1a9   : > { %v1587_v9 = vpop.f32.mrf.mxu1  ;;  %v1714_v22 = vpop.f32.mrf.mxu3  ;;  %2167 = vmatpush.msrb.mxu0 %v2075_v24  ;;  %2104 = vmatpush.msrb.mxu3 %v2057_v13 }
 0x1aa   : > { %v1715_v63 = vadd.f32 %v1714_v22, %v1650_v62  ;;  %v1588_v61 = vadd.f32 %v1587_v9, %v1523_v4  ;;  %v1275_v62 = vadd.f32 %v3567_v59, %v3544_v44  ;;  %v1467_v26 = vadd.f32 %v3728_v18, %v1402_v50  ;;  %v2074_v44 = vld [vmem:[%s4076_s7 + $0x98] sm:$0xff]  ;;  %v4096_v50 = vld [vmem:[#allocation16_spill] sm:$0xff] }
 0x1ab   : > { %v1779_v41 = vpop.f32.mrf.mxu0  ;;  %2168 = vmatpush.msrb.mxu0 %v2074_v44  ;;  %2105 = vmatpush.msrb.mxu3 %v2056_v5 }
 0x1ac   : > { %v1780_v2 = vadd.f32 %v1779_v41, %v1715_v63  ;;  %v1340_v55 = vadd.f32 %v3726_v15, %v1275_v62  ;;  %v1532_v18 = vadd.f32 %v3730_v32, %v1467_v26 }
 0x1ae   : > { %v1813_v23 = vmax.f32 %v1780_v2, 0.0  ;;  %v1652_v30 = vpop.f32.mrf.mxu2  ;;  %v1405_v51 = vadd.f32 %v3736_v49, %v1340_v55 }
 0x1af   : > { %v1653_v36 = vadd.f32 %v1652_v30, %v1588_v61  ;;  %v1278_v61 = vadd.f32 %v3567_v59, %v3559_v53  ;;  %v2073_v53 = vld [vmem:[%s4076_s7 + $0x90] sm:$0xff] }
 0x1b0   : > { %2769 = vmatmul.msk.f32.gmra.mxu1 %vm1844_vm0, %v1813_v23  ;;  %2785 = vmatmul.msk.f32.gmra.mxu2 %vm1844_vm0, %v1813_v23  ;;  %v1470_v23 = vadd.f32 %v3740_v54, %v1405_v51 }
 0x1b1   : > { %v1590_v38 = vpop.f32.mrf.mxu1  ;;  %v1717_v11 = vpop.f32.mrf.mxu3  ;;  %v1343_v32 = vadd.f32 %v3738_v6, %v1278_v61  ;;  %2169 = vmatpush.msrb.mxu0 %v2073_v53 }
 0x1b2   : > { %v1718_v16 = vadd.f32 %v1717_v11, %v1653_v36  ;;  %v1591_v0 = vadd.f32 %v1590_v38, %v1526_v35  ;;  %v1535_v59 = vadd.f32 %v3742_v20, %v1470_v23  ;;  %v2055_v20 = vld [vmem:[%s4076_s7] sm:$0xff] }
 0x1b3   : > { %v1782_v29 = vpop.f32.mrf.mxu0  ;;  %v1408_v54 = vadd.f32 %v3747_v31, %v1343_v32  ;;  %v2072_v31 = vld [vmem:[%s4076_s7 + $0x88] sm:$0xff]  ;;  %2106 = vmatpush.msrb.mxu3 %v2055_v20 }
 0x1b4   : > { %v1783_v7 = vadd.f32 %v1782_v29, %v1718_v16  ;;  %2170 = vmatpush.msrb.mxu0 %v2072_v31 }
 0x1b5   : > { %v1473_v57 = vadd.f32 %v3751_v8, %v1408_v54 }
 0x1b6   : > { %v1814_v45 = vmax.f32 %v1783_v7, 0.0  ;;  %v1655_v56 = vpop.f32.mrf.mxu2 }
 0x1b7   : > { %v1656_v43 = vadd.f32 %v1655_v56, %v1591_v0  ;;  %v1538_v0 = vadd.f32 %v3756_v60, %v1473_v57 }
 0x1b8   : > { %2770 = vmatmul.msk.f32.gmra.mxu1 %vm1844_vm0, %v1814_v45  ;;  %2786 = vmatmul.msk.f32.gmra.mxu2 %vm1844_vm0, %v1814_v45  ;;  %v1411_v45 = vadd.f32 %v3758_v12, %v1346_v39  ;;  %v2071_v12 = vld [vmem:[%s4076_s7 + $0x80] sm:$0xff] }
 0x1b9   : > { %v1593_v17 = vpop.f32.mrf.mxu1  ;;  %v1720_v52 = vpop.f32.mrf.mxu3  ;;  %2171 = vmatpush.msrb.mxu0 %v2071_v12 }
 0x1ba   : > { %v1721_v33 = vadd.f32 %v1720_v52, %v1656_v43  ;;  %v1594_v21 = vadd.f32 %v1593_v17, %v1529_v46  ;;  %v1476_v52 = vadd.f32 %v3762_v28, %v1411_v45 }
 0x1bb   : > { %v1785_v27 = vpop.f32.mrf.mxu0 }
 0x1bc   : > { %v1786_v37 = vadd.f32 %v1785_v27, %v1721_v33  ;;  %v1541_v27 = vadd.f32 %v4096_v50, %v1476_v52 }
 0x1be   : > { %v1815_v10 = vmax.f32 %v1786_v37, 0.0  ;;  %v1658_v25 = vpop.f32.mrf.mxu2  ;;  %v4097_v37 = vld [vmem:[#allocation17_spill] sm:$0xff] }
 0x1bf   : > { %v1659_v9 = vadd.f32 %v1658_v25, %v1594_v21  ;;  %v1414_v21 = vadd.f32 %v4097_v37, %v1349_v1 }
 0x1c0   : > { %2771 = vmatmul.msk.f32.gmra.mxu1 %vm1844_vm0, %v1815_v10  ;;  %2787 = vmatmul.msk.f32.gmra.mxu2 %vm1844_vm0, %v1815_v10 }
 0x1c1   : > { %v1596_v40 = vpop.f32.mrf.mxu1  ;;  %v1723_v22 = vpop.f32.mrf.mxu3 }
 0x1c2   : > { %v1724_v63 = vadd.f32 %v1723_v22, %v1659_v9  ;;  %v1597_v15 = vadd.f32 %v1596_v40, %v1532_v18  ;;  %v4098_v9 = vld [vmem:[#allocation18_spill] sm:$0xff] }
 0x1c3   : > { %v1788_v4 = vpop.f32.mrf.mxu0  ;;  %v1479_v55 = vadd.f32 %v4098_v9, %v1414_v21 }
 0x1c4   : > { %v1789_v14 = vadd.f32 %v1788_v4, %v1724_v63 }
 0x1c5   : > { %v1544_v44 = vadd.f32 %v3785_v47, %v1479_v55 }
 0x1c6   : > { %v1816_v41 = vmax.f32 %v1789_v14, 0.0  ;;  %v1661_v2 = vpop.f32.mrf.mxu2 }
 0x1c7   : > { %v1662_v30 = vadd.f32 %v1661_v2, %v1597_v15 }
 0x1c8   : > { %2772 = vmatmul.msk.f32.gmra.mxu1 %vm1844_vm0, %v1816_v41  ;;  %2788 = vmatmul.msk.f32.gmra.mxu2 %vm1844_vm0, %v1816_v41 }
 0x1c9   : > { %v1599_v49 = vpop.f32.mrf.mxu1  ;;  %v1726_v19 = vpop.f32.mrf.mxu3 }
 0x1ca   : > { %v1727_v36 = vadd.f32 %v1726_v19, %v1662_v30  ;;  %v1600_v6 = vadd.f32 %v1599_v49, %v1535_v59  ;;  %v1838_v49 = vld [vmem:[%s4075_s6] sm:$0x3] }
 0x1cb   : > { %v1791_v38 = vpop.f32.mrf.mxu0  ;;  %v3961_v47 = vperm.slane %v1838_v49, 0  ;;  %v3964_v53 = vperm.slane %v1838_v49, 1 }
 0x1cc   : > { %v1792_v11 = vadd.f32 %v1791_v38, %v1727_v36 }
 0x1ce   : > { %v1817_v16 = vmax.f32 %v1792_v11, 0.0  ;;  %v1664_v48 = vpop.f32.mrf.mxu2 }
 0x1cf   : > { %v1665_v35 = vadd.f32 %v1664_v48, %v1600_v6 }
 0x1d0   : > { %2773 = vmatmul.msk.f32.gmra.mxu1 %vm1844_vm0, %v1817_v16  ;;  %2789 = vmatmul.msk.f32.gmra.mxu2 %vm1844_vm0, %v1817_v16 }
 0x1d1   : > { %v1602_v29 = vpop.f32.mrf.mxu1  ;;  %v1729_v7 = vpop.f32.mrf.mxu3 }
 0x1d2   : > { %v1730_v8 = vadd.f32 %v1729_v7, %v1665_v35  ;;  %v1603_v43 = vadd.f32 %v1602_v29, %v1538_v0 }
 0x1d3   : > { %v1794_v56 = vpop.f32.mrf.mxu0 }
 0x1d4   : > { %v1795_v34 = vadd.f32 %v1794_v56, %v1730_v8 }
 0x1d6   : > { %v1818_v42 = vmax.f32 %v1795_v34, 0.0  ;;  %v1667_v17 = vpop.f32.mrf.mxu2 }
 0x1d7   : > { %v1668_v33 = vadd.f32 %v1667_v17, %v1603_v43 }
 0x1d8   : > { %2774 = vmatmul.msk.f32.gmra.mxu1 %vm1844_vm0, %v1818_v42  ;;  %2790 = vmatmul.msk.f32.gmra.mxu2 %vm1844_vm0, %v1818_v42 }
 0x1d9   : > { %v1605_v24 = vpop.f32.mrf.mxu1  ;;  %v1732_v46 = vpop.f32.mrf.mxu3 }
 0x1da   : > { %v1733_v60 = vadd.f32 %v1732_v46, %v1668_v33  ;;  %v1606_v25 = vadd.f32 %v1605_v24, %v1541_v27 }
 0x1db   : > { %v1797_v28 = vpop.f32.mrf.mxu0 }
 0x1dc   : > { %v1798_v10 = vadd.f32 %v1797_v28, %v1733_v60 }
 0x1de   : > { %v1819_v62 = vmax.f32 %v1798_v10, 0.0  ;;  %v1670_v26 = vpop.f32.mrf.mxu2 }
 0x1df   : > { %v1671_v40 = vadd.f32 %v1670_v26, %v1606_v25 }
 0x1e0   : > { %2775 = vmatmul.msk.f32.gmra.mxu1 %vm1844_vm0, %v1819_v62  ;;  %2791 = vmatmul.msk.f32.gmra.mxu2 %vm1844_vm0, %v1819_v62 }
 0x1e1   : > { %v1735_v22 = vpop.f32.mrf.mxu3  ;;  %v1608_v63 = vpop.f32.mrf.mxu1 }
 0x1e2   : > { %v1736_v13 = vadd.f32 %v1735_v22, %v1671_v40  ;;  %v1609_v4 = vadd.f32 %v1608_v63, %v1544_v44 }
 0x1e3   : > { %v1800_v18 = vpop.f32.mrf.mxu0 }
 0x1e4   : > { %v1801_v51 = vadd.f32 %v1800_v18, %v1736_v13 }
 0x1e6   : > { %v1820_v14 = vmax.f32 %v1801_v51, 0.0  ;;  %v1673_v15 = vpop.f32.mrf.mxu2 }
 0x1e7   : > { %v1674_v41 = vadd.f32 %v1673_v15, %v1609_v4 }
 0x1e8   : > { %2776 = vmatmul.msk.f32.gmra.mxu1 %vm1844_vm0, %v1820_v14  ;;  %2792 = vmatmul.msk.f32.gmra.mxu2 %vm1844_vm0, %v1820_v14 }
 0x1e9   : > { %v1738_v2 = vpop.f32.mrf.mxu3 }
 0x1ea   : > { %v1739_v61 = vadd.f32 %v1738_v2, %v1674_v41 }
 0x1eb   : > { %v1803_v23 = vpop.f32.mrf.mxu0 }
 0x1ec   : > { %v1804_v30 = vadd.f32 %v1803_v23, %v1739_v61 }
 0x1ee   : > { %v1821_v32 = vmax.f32 %v1804_v30, 0.0 }
 0x1f0   : > { %2777 = vmatmul.msk.f32.gmra.mxu1 %vm1844_vm0, %v1821_v32  ;;  %2793 = vmatmul.msk.f32.gmra.mxu2 %vm1844_vm0, %v1821_v32 }
 0x1f5   : > { %v1910_v19 = vpop.f32.mrf.mxu1 }
 0x1f6   : > { %v1911_v36 = vadd.f32 %v1910_v19, %v3961_v47 }
 0x1f8   : > { %v2023_v5 = vmax.f32 %v1911_v36, 0.0 }
 0x1fa   : > { %2107 = vmatmul.f32.vlgmr.msrb.gmra.mxu3 %v2023_v5 }
 0x1fb   : > { %v1975_v59 = vpop.f32.mrf.mxu2 }
 0x1fc   : > { %v1976_v54 = vadd.f32 %v1975_v59, %v3964_v53 }
 0x1fd   : > { %v1913_v38 = vpop.f32.mrf.mxu1 }
 0x1fe   : > { %v2024_v11 = vmax.f32 %v1976_v54, 0.0  ;;  %v1914_v6 = vadd.f32 %v1913_v38, %v3961_v47 }
 0x200   : > { %v2025_v16 = vmax.f32 %v1914_v6, 0.0  ;;  %2172 = vmatmul.f32.vlgmr.msrb.gmra.mxu0 %v2024_v11 }
 0x202   : > { %2110 = vmatmul.f32.gmra.mxu3 %v2025_v16 }
 0x203   : > { %v1978_v48 = vpop.f32.mrf.mxu2 }
 0x204   : > { %v1979_v57 = vadd.f32 %v1978_v48, %v3964_v53 }
 0x205   : > { %v1916_v35 = vpop.f32.mrf.mxu1 }
 0x206   : > { %v2026_v20 = vmax.f32 %v1979_v57, 0.0  ;;  %v1917_v31 = vadd.f32 %v1916_v35, %v3961_v47 }
 0x208   : > { %v2027_v39 = vmax.f32 %v1917_v31, 0.0  ;;  %2175 = vmatmul.f32.gmra.mxu0 %v2026_v20 }
 0x20a   : > { %2113 = vmatmul.f32.gmra.mxu3 %v2027_v39 }
 0x20b   : > { %v1981_v29 = vpop.f32.mrf.mxu2 }
 0x20c   : > { %v1982_v7 = vadd.f32 %v1981_v29, %v3964_v53 }
 0x20d   : > { %v1919_v8 = vpop.f32.mrf.mxu1 }
 0x20e   : > { %v2028_v0 = vmax.f32 %v1982_v7, 0.0  ;;  %v1920_v45 = vadd.f32 %v1919_v8, %v3961_v47 }
 0x210   : > { %v2029_v56 = vmax.f32 %v1920_v45, 0.0  ;;  %2178 = vmatmul.f32.gmra.mxu0 %v2028_v0 }
 0x212   : > { %2116 = vmatmul.f32.gmra.mxu3 %v2029_v56 }
 0x213   : > { %v1984_v34 = vpop.f32.mrf.mxu2 }
 0x214   : > { %v1985_v43 = vadd.f32 %v1984_v34, %v3964_v53 }
 0x215   : > { %v1922_v42 = vpop.f32.mrf.mxu1 }
 0x216   : > { %v2030_v17 = vmax.f32 %v1985_v43, 0.0  ;;  %v1923_v52 = vadd.f32 %v1922_v42, %v3961_v47 }
 0x218   : > { %v2031_v33 = vmax.f32 %v1923_v52, 0.0  ;;  %2181 = vmatmul.f32.gmra.mxu0 %v2030_v17 }
 0x21a   : > { %2119 = vmatmul.f32.gmra.mxu3 %v2031_v33 }
 0x21b   : > { %v1987_v3 = vpop.f32.mrf.mxu2 }
 0x21c   : > { %v1988_v58 = vadd.f32 %v1987_v3, %v3964_v53 }
 0x21d   : > { %v1925_v1 = vpop.f32.mrf.mxu1 }
 0x21e   : > { %v2032_v24 = vmax.f32 %v1988_v58, 0.0  ;;  %v1926_v46 = vadd.f32 %v1925_v1, %v3961_v47 }
 0x220   : > { %v2033_v60 = vmax.f32 %v1926_v46, 0.0  ;;  %2184 = vmatmul.f32.gmra.mxu0 %v2032_v24 }
 0x222   : > { %2122 = vmatmul.f32.gmra.mxu3 %v2033_v60 }
 0x223   : > { %v1990_v12 = vpop.f32.mrf.mxu2 }
 0x224   : > { %v1991_v50 = vadd.f32 %v1990_v12, %v3964_v53 }
 0x225   : > { %v1928_v27 = vpop.f32.mrf.mxu1 }
 0x226   : > { %v2034_v37 = vmax.f32 %v1991_v50, 0.0  ;;  %v1929_v21 = vadd.f32 %v1928_v27, %v3961_v47  ;;  %v3997_v50 = vld [vmem:[#allocation9] ss:$0 sm:$0xff] }
 0x228   : > { %v2035_v28 = vmax.f32 %v1929_v21, 0.0  ;;  %2187 = vmatmul.f32.gmra.mxu0 %v2034_v37 }
 0x22a   : > { %2125 = vmatmul.f32.gmra.mxu3 %v2035_v28 }
 0x22b   : > { %v1993_v10 = vpop.f32.mrf.mxu2 }
 0x22c   : > { %v1994_v25 = vadd.f32 %v1993_v10, %v3964_v53 }
 0x22d   : > { %v1931_v62 = vpop.f32.mrf.mxu1 }
 0x22e   : > { %v2036_v26 = vmax.f32 %v1994_v25, 0.0  ;;  %v1932_v9 = vadd.f32 %v1931_v62, %v3961_v47 }
 0x230   : > { %v2037_v55 = vmax.f32 %v1932_v9, 0.0  ;;  %2190 = vmatmul.f32.gmra.mxu0 %v2036_v26 }
 0x232   : > { %2128 = vmatmul.f32.gmra.mxu3 %v2037_v55 }
 0x233   : > { %v1996_v40 = vpop.f32.mrf.mxu2 }
 0x234   : > { %v1997_v22 = vadd.f32 %v1996_v40, %v3964_v53 }
 0x235   : > { %v1934_v63 = vpop.f32.mrf.mxu1 }
 0x236   : > { %v2038_v13 = vmax.f32 %v1997_v22, 0.0  ;;  %v1935_v44 = vadd.f32 %v1934_v63, %v3961_v47 }
 0x238   : > { %v2039_v18 = vmax.f32 %v1935_v44, 0.0  ;;  %2193 = vmatmul.f32.gmra.mxu0 %v2038_v13 }
 0x23a   : > { %2131 = vmatmul.f32.gmra.mxu3 %v2039_v18 }
 0x23b   : > { %v1999_v51 = vpop.f32.mrf.mxu2 }
 0x23c   : > { %v2000_v4 = vadd.f32 %v1999_v51, %v3964_v53 }
 0x23d   : > { %v1937_v14 = vpop.f32.mrf.mxu1 }
 0x23e   : > { %v2040_v15 = vmax.f32 %v2000_v4, 0.0  ;;  %v1938_v41 = vadd.f32 %v1937_v14, %v3961_v47 }
 0x240   : > { %v2041_v2 = vmax.f32 %v1938_v41, 0.0  ;;  %2196 = vmatmul.f32.gmra.mxu0 %v2040_v15 }
 0x242   : > { %2134 = vmatmul.f32.gmra.mxu3 %v2041_v2 }
 0x243   : > { %v2002_v61 = vpop.f32.mrf.mxu2 }
 0x244   : > { %v2003_v23 = vadd.f32 %v2002_v61, %v3964_v53 }
 0x245   : > { %v1940_v30 = vpop.f32.mrf.mxu1 }
 0x246   : > { %v2042_v32 = vmax.f32 %v2003_v23, 0.0  ;;  %v1941_v49 = vadd.f32 %v1940_v30, %v3961_v47 }
 0x248   : > { %v2043_v19 = vmax.f32 %v1941_v49, 0.0  ;;  %2199 = vmatmul.f32.gmra.mxu0 %v2042_v32 }
 0x24a   : > { %2137 = vmatmul.f32.gmra.mxu3 %v2043_v19 }
 0x24b   : > { %v2005_v36 = vpop.f32.mrf.mxu2 }
 0x24c   : > { %v2006_v5 = vadd.f32 %v2005_v36, %v3964_v53 }
 0x24d   : > { %v1943_v59 = vpop.f32.mrf.mxu1 }
 0x24e   : > { %v2044_v54 = vmax.f32 %v2006_v5, 0.0  ;;  %v1944_v38 = vadd.f32 %v1943_v59, %v3961_v47 }
 0x250   : > { %v2045_v11 = vmax.f32 %v1944_v38, 0.0  ;;  %2202 = vmatmul.f32.gmra.mxu0 %v2044_v54 }
 0x252   : > { %2140 = vmatmul.f32.gmra.mxu3 %v2045_v11 }
 0x253   : > { %v2008_v6 = vpop.f32.mrf.mxu2 }
 0x254   : > { %v2009_v16 = vadd.f32 %v2008_v6, %v3964_v53 }
 0x255   : > { %v1946_v48 = vpop.f32.mrf.mxu1 }
 0x256   : > { %v2046_v57 = vmax.f32 %v2009_v16, 0.0  ;;  %v1947_v35 = vadd.f32 %v1946_v48, %v3961_v47 }
 0x258   : > { %v2047_v20 = vmax.f32 %v1947_v35, 0.0  ;;  %2205 = vmatmul.f32.gmra.mxu0 %v2046_v57 }
 0x25a   : > { %2143 = vmatmul.f32.gmra.mxu3 %v2047_v20 }
 0x25b   : > { %v2011_v31 = vpop.f32.mrf.mxu2 }
 0x25c   : > { %v2012_v39 = vadd.f32 %v2011_v31, %v3964_v53 }
 0x25d   : > { %v1949_v29 = vpop.f32.mrf.mxu1 }
 0x25e   : > { %v2048_v7 = vmax.f32 %v2012_v39, 0.0  ;;  %v1950_v8 = vadd.f32 %v1949_v29, %v3961_v47 }
 0x260   : > { %v2049_v0 = vmax.f32 %v1950_v8, 0.0  ;;  %2208 = vmatmul.f32.gmra.mxu0 %v2048_v7 }
 0x262   : > { %2146 = vmatmul.f32.gmra.mxu3 %v2049_v0 }
 0x263   : > { %v2014_v45 = vpop.f32.mrf.mxu2 }
 0x264   : > { %v2015_v56 = vadd.f32 %v2014_v45, %v3964_v53 }
 0x265   : > { %v1952_v34 = vpop.f32.mrf.mxu1 }
 0x266   : > { %v2050_v43 = vmax.f32 %v2015_v56, 0.0  ;;  %v1953_v42 = vadd.f32 %v1952_v34, %v3961_v47 }
 0x268   : > { %v2051_v17 = vmax.f32 %v1953_v42, 0.0  ;;  %2211 = vmatmul.f32.gmra.mxu0 %v2050_v43 }
 0x26a   : > { %2149 = vmatmul.f32.gmra.mxu3 %v2051_v17 }
 0x26b   : > { %v2017_v52 = vpop.f32.mrf.mxu2 }
 0x26c   : > { %v2018_v33 = vadd.f32 %v2017_v52, %v3964_v53 }
 0x26d   : > { %v1955_v3 = vpop.f32.mrf.mxu1 }
 0x26e   : > { %v2052_v58 = vmax.f32 %v2018_v33, 0.0  ;;  %v1956_v1 = vadd.f32 %v1955_v3, %v3961_v47 }
 0x270   : > { %v2053_v24 = vmax.f32 %v1956_v1, 0.0  ;;  %2214 = vmatmul.f32.gmra.mxu0 %v2052_v58 }
 0x272   : > { %2152 = vmatmul.f32.gmra.mxu3 %v2053_v24 }
 0x273   : > { %v2020_v46 = vpop.f32.mrf.mxu2 }
 0x274   : > { %v2021_v60 = vadd.f32 %v2020_v46, %v3964_v53 }
 0x276   : > { %v2054_v12 = vmax.f32 %v2021_v60, 0.0 }
 0x278   : > { %2217 = vmatmul.f32.gmra.mxu0 %v2054_v12 }
 0x27d   : > { %v2108_v27 = vpop.f32.mrf.mxu3  ;;  %v2173_v37 = vpop.f32.mrf.mxu0 }
 0x27e   : > { %v2109_v21 = vadd.f32 %v3997_v50, %v2108_v27 }
 0x280   : > { %v2174_v28 = vadd.f32 %v2173_v37, %v2109_v21 }
 0x282   : > { %v2221_v10 = vsub.f32 0.0, %v2174_v28 }
 0x284   : > { %v2237_v25 = vmul.f32 1.442695, %v2221_v10 }
 0x285   : > { %v2111_v62 = vpop.f32.mrf.mxu3  ;;  %v2176_v26 = vpop.f32.mrf.mxu0 }
 0x286   : > { %2943 = vpow2.f32 %v2237_v25  ;;  %v2112_v47 = vadd.f32 %v3997_v50, %v2111_v62 }
 0x288   : > { %v2177_v9 = vadd.f32 %v2176_v26, %v2112_v47 }
 0x28a   : > { %v2222_v53 = vsub.f32 0.0, %v2177_v9 }
 0x28c   : > { %v2944_v55 = vpop.eup %2943  ;;  %v2239_v40 = vmul.f32 1.442695, %v2222_v53 }
 0x28d   : > { %v2269_v22 = vadd.f32 1.0, %v2944_v55  ;;  %v2114_v63 = vpop.f32.mrf.mxu3  ;;  %v2179_v13 = vpop.f32.mrf.mxu0 }
 0x28e   : > { %2945 = vpow2.f32 %v2239_v40  ;;  %v2115_v44 = vadd.f32 %v3997_v50, %v2114_v63 }
 0x28f   : > { %2947 = vrcp.f32 %v2269_v22  ;;  %v2296_v19 = vand.u32 2147483648, %v2269_v22  ;;  %v2294_v5 = vand.u32 2147483647, %v2269_v22  ;;  %vm2290_vm2 = vweird.f32 %v2269_v22 }
 0x290   : > { %v2180_v18 = vadd.f32 %v2179_v13, %v2115_v44 }
 0x291   : > { %v2297_v16 = vor.u32 1.1754944e-38, %v2296_v19  ;;  %vm2295_vm5 = vcmp.eq.f32.partialorder %v2294_v5, 8.507059e+37 }
 0x292   : > { %v2223_v51 = vsub.f32 0.0, %v2180_v18 }
 0x294   : > { %v2946_v4 = vpop.eup %2945  ;;  %v2241_v14 = vmul.f32 1.442695, %v2223_v51 }
 0x295   : > { %v2948_v15 = vpop.eup %2947  ;;  %v2270_v41 = vadd.f32 1.0, %v2946_v4  ;;  %v2117_v2 = vpop.f32.mrf.mxu3 }
 0x296   : > { %v2182_v61 = vpop.f32.mrf.mxu0  ;;  %v2286_v23 = vmul.f32 %v2948_v15, %v2269_v22  ;;  %2949 = vpow2.f32 %v2241_v14  ;;  %v2118_v30 = vadd.f32 %v3997_v50, %v2117_v2  ;;  %vm2291_vm1 = vweird.f32 %v2948_v15 }
 0x297   : > { %2951 = vrcp.f32 %v2270_v41  ;;  %vm2292_vm3 = vmor %vm2290_vm2, %vm2291_vm1  ;;  %v2311_v8 = vand.u32 2147483648, %v2270_v41  ;;  %v2309_v45 = vand.u32 2147483647, %v2270_v41  ;;  %vm2305_vm7 = vweird.f32 %v2270_v41 }
 0x298   : > { %v2287_v32 = vsub.f32 1.0, %v2286_v23  ;;  %v2183_v49 = vadd.f32 %v2182_v61, %v2118_v30 }
 0x299   : > { %v2312_v52 = vor.u32 1.1754944e-38, %v2311_v8  ;;  %vm2310_vm9 = vcmp.eq.f32.partialorder %v2309_v45, 8.507059e+37 }
 0x29a   : > { %v2288_v36 = vmul.f32 %v2948_v15, %v2287_v32  ;;  %v2224_v59 = vsub.f32 0.0, %v2183_v49 }
 0x29c   : > { %v2950_v54 = vpop.eup %2949  ;;  %v2289_v38 = vadd.f32 %v2948_v15, %v2288_v36  ;;  %v2243_v11 = vmul.f32 1.442695, %v2224_v59 }
 0x29d   : > { %v2952_v6 = vpop.eup %2951  ;;  %v2271_v48 = vadd.f32 1.0, %v2950_v54  ;;  %v2120_v57 = vpop.f32.mrf.mxu3 }
 0x29e   : > { %v2185_v35 = vpop.f32.mrf.mxu0  ;;  %v2293_v20 = vsel %vm2292_vm3, %v2948_v15, %v2289_v38  ;;  %v2301_v31 = vmul.f32 %v2952_v6, %v2270_v41  ;;  %2953 = vpow2.f32 %v2243_v11  ;;  %v2121_v7 = vadd.f32 %v3997_v50, %v2120_v57 }
 0x29f   : > { %v2298_v39 = vsel %vm2295_vm5, %v2297_v16, %v2293_v20  ;;  %2955 = vrcp.f32 %v2271_v48  ;;  %vm2306_vm6 = vweird.f32 %v2952_v6  ;;  %v2326_v37 = vand.u32 2147483648, %v2271_v48 }
 0x2a0   : > { %2526 = vst.msk [vmem:[%s4008_s28] sm:$0xff] %vm2525_vm4, %v2298_v39  ;;  %v2302_v29 = vsub.f32 1.0, %v2301_v31  ;;  %v2186_v56 = vadd.f32 %v2185_v35, %v2121_v7  ;;  %vm2307_vm8 = vmor %vm2305_vm7, %vm2306_vm6  ;;  %v2324_v28 = vand.u32 2147483647, %v2271_v48  ;;  %vm2320_vm11 = vweird.f32 %v2271_v48 }
 0x2a1   : > { %v2327_v47 = vor.u32 1.1754944e-38, %v2326_v37 }
 0x2a2   : > { %v2303_v0 = vmul.f32 %v2952_v6, %v2302_v29  ;;  %v2225_v42 = vsub.f32 0.0, %v2186_v56  ;;  %vm2325_vm13 = vcmp.eq.f32.partialorder %v2324_v28, 8.507059e+37 }
 0x2a4   : > { %v2954_v34 = vpop.eup %2953  ;;  %v2304_v43 = vadd.f32 %v2952_v6, %v2303_v0  ;;  %v2245_v46 = vmul.f32 1.442695, %v2225_v42 }
 0x2a5   : > { %v2956_v17 = vpop.eup %2955  ;;  %v2272_v33 = vadd.f32 1.0, %v2954_v34  ;;  %v2123_v3 = vpop.f32.mrf.mxu3 }
 0x2a6   : > { %v2188_v58 = vpop.f32.mrf.mxu0  ;;  %v2308_v1 = vsel %vm2307_vm8, %v2952_v6, %v2304_v43  ;;  %v2316_v24 = vmul.f32 %v2956_v17, %v2271_v48  ;;  %v2124_v27 = vadd.f32 %v3997_v50, %v2123_v3  ;;  %vm2321_vm10 = vweird.f32 %v2956_v17 }
 0x2a7   : > { %v2313_v60 = vsel %vm2310_vm9, %v2312_v52, %v2308_v1  ;;  %2957 = vrcp.f32 %v2272_v33  ;;  %vm2322_vm12 = vmor %vm2320_vm11, %vm2321_vm10  ;;  %v2341_v4 = vand.u32 2147483648, %v2272_v33  ;;  %v2339_v15 = vand.u32 2147483647, %v2272_v33 }
 0x2a8   : > { %2527 = vst.msk [vmem:[%s4008_s28 + $0x8] sm:$0xff] %vm2525_vm4, %v2313_v60  ;;  %v2317_v12 = vsub.f32 1.0, %v2316_v24  ;;  %2959 = vpow2.f32 %v2245_v46  ;;  %v2189_v10 = vadd.f32 %v2188_v58, %v2124_v27  ;;  %vm2335_vm15 = vweird.f32 %v2272_v33 }
 0x2a9   : > { %v2342_v23 = vor.u32 1.1754944e-38, %v2341_v4  ;;  %vm2340_vm1 = vcmp.eq.f32.partialorder %v2339_v15, 8.507059e+37 }
 0x2aa   : > { %v2318_v21 = vmul.f32 %v2956_v17, %v2317_v12  ;;  %v2226_v62 = vsub.f32 0.0, %v2189_v10 }
 0x2ac   : > { %v2319_v25 = vadd.f32 %v2956_v17, %v2318_v21  ;;  %v2247_v63 = vmul.f32 1.442695, %v2226_v62 }
 0x2ad   : > { %v2958_v26 = vpop.eup %2957  ;;  %v2126_v9 = vpop.f32.mrf.mxu3 }
 0x2ae   : > { %v2191_v53 = vpop.f32.mrf.mxu0  ;;  %v2960_v55 = vpop.eup %2959  ;;  %v2323_v40 = vsel %vm2322_vm12, %v2956_v17, %v2319_v25  ;;  %v2331_v22 = vmul.f32 %v2958_v26, %v2272_v33  ;;  %v2127_v18 = vadd.f32 %v3997_v50, %v2126_v9  ;;  %2961 = vpow2.f32 %v2247_v63 }
 0x2af   : > { %v2328_v13 = vsel %vm2325_vm13, %v2327_v47, %v2323_v40  ;;  %v2273_v44 = vadd.f32 1.0, %v2960_v55  ;;  %vm2336_vm14 = vweird.f32 %v2958_v26 }
 0x2b0   : > { %2528 = vst.msk [vmem:[%s4008_s28 + $0x10] sm:$0xff] %vm2525_vm4, %v2328_v13  ;;  %v2332_v51 = vsub.f32 1.0, %v2331_v22  ;;  %v2192_v41 = vadd.f32 %v2191_v53, %v2127_v18  ;;  %vm2337_vm0 = vmor %vm2335_vm15, %vm2336_vm14 }
 0x2b1   : > { %2963 = vrcp.f32 %v2273_v44  ;;  %v2356_v57 = vand.u32 2147483648, %v2273_v44  ;;  %v2354_v20 = vand.u32 2147483647, %v2273_v44  ;;  %vm2350_vm3 = vweird.f32 %v2273_v44 }
 0x2b2   : > { %v2333_v14 = vmul.f32 %v2958_v26, %v2332_v51  ;;  %v2227_v61 = vsub.f32 0.0, %v2192_v41 }
 0x2b3   : > { %v2357_v56 = vor.u32 1.1754944e-38, %v2356_v57  ;;  %vm2355_vm6 = vcmp.eq.f32.partialorder %v2354_v20, 8.507059e+37 }
 0x2b4   : > { %v2334_v2 = vadd.f32 %v2958_v26, %v2333_v14  ;;  %v2962_v49 = vpop.eup %2961  ;;  %v2249_v36 = vmul.f32 1.442695, %v2227_v61 }
 0x2b5   : > { %v2129_v30 = vpop.f32.mrf.mxu3  ;;  %v2274_v38 = vadd.f32 1.0, %v2962_v49 }
 0x2b6   : > { %v2194_v32 = vpop.f32.mrf.mxu0  ;;  %v2338_v19 = vsel %vm2337_vm0, %v2958_v26, %v2334_v2  ;;  %v2130_v5 = vadd.f32 %v3997_v50, %v2129_v30  ;;  %2965 = vpow2.f32 %v2249_v36 }
 0x2b7   : > { %v2964_v59 = vpop.eup %2963  ;;  %v2343_v54 = vsel %vm2340_vm1, %v2342_v23, %v2338_v19  ;;  %2967 = vrcp.f32 %v2274_v38  ;;  %v2371_v58 = vand.u32 2147483648, %v2274_v38  ;;  %v2369_v46 = vand.u32 2147483647, %v2274_v38 }
 0x2b8   : > { %2529 = vst.msk [vmem:[%s4008_s28 + $0x18] sm:$0xff] %vm2525_vm4, %v2343_v54  ;;  %v2346_v11 = vmul.f32 %v2964_v59, %v2273_v44  ;;  %v2195_v6 = vadd.f32 %v2194_v32, %v2130_v5  ;;  %vm2351_vm2 = vweird.f32 %v2964_v59  ;;  %vm2365_vm8 = vweird.f32 %v2274_v38 }
 0x2b9   : > { %vm2352_vm5 = vmor %vm2350_vm3, %vm2351_vm2  ;;  %v2372_v25 = vor.u32 1.1754944e-38, %v2371_v58  ;;  %vm2370_vm10 = vcmp.eq.f32.partialorder %v2369_v46, 8.507059e+37 }
 0x2ba   : > { %v2347_v16 = vsub.f32 1.0, %v2346_v11  ;;  %v2228_v48 = vsub.f32 0.0, %v2195_v6 }
 0x2bc   : > { %v2348_v35 = vmul.f32 %v2964_v59, %v2347_v16  ;;  %v2251_v31 = vmul.f32 1.442695, %v2228_v48  ;;  %v2966_v7 = vpop.eup %2965 }
 0x2bd   : > { %v2132_v39 = vpop.f32.mrf.mxu3  ;;  %v2968_v45 = vpop.eup %2967  ;;  %v2275_v34 = vadd.f32 1.0, %v2966_v7 }
 0x2be   : > { %v2197_v29 = vpop.f32.mrf.mxu0  ;;  %v2349_v8 = vadd.f32 %v2964_v59, %v2348_v35  ;;  %2969 = vpow2.f32 %v2251_v31  ;;  %v2133_v0 = vadd.f32 %v3997_v50, %v2132_v39  ;;  %v2361_v42 = vmul.f32 %v2968_v45, %v2274_v38 }
 0x2bf   : > { %2971 = vrcp.f32 %v2275_v34  ;;  %vm2366_vm7 = vweird.f32 %v2968_v45  ;;  %v2386_v40 = vand.u32 2147483648, %v2275_v34  ;;  %v2384_v13 = vand.u32 2147483647, %v2275_v34 }
 0x2c0   : > { %v2353_v43 = vsel %vm2352_vm5, %v2964_v59, %v2349_v8  ;;  %v2198_v17 = vadd.f32 %v2197_v29, %v2133_v0  ;;  %v2362_v33 = vsub.f32 1.0, %v2361_v42  ;;  %vm2367_vm9 = vmor %vm2365_vm8, %vm2366_vm7  ;;  %vm2380_vm12 = vweird.f32 %v2275_v34 }
 0x2c1   : > { %v2358_v52 = vsel %vm2355_vm6, %v2357_v56, %v2353_v43  ;;  %v2387_v2 = vor.u32 1.1754944e-38, %v2386_v40  ;;  %vm2385_vm14 = vcmp.eq.f32.partialorder %v2384_v13, 8.507059e+37 }
 0x2c2   : > { %2530 = vst.msk [vmem:[%s4008_s28 + $0x20] sm:$0xff] %vm2525_vm4, %v2358_v52  ;;  %v2229_v3 = vsub.f32 0.0, %v2198_v17  ;;  %v2363_v24 = vmul.f32 %v2968_v45, %v2362_v33 }
 0x2c4   : > { %v2970_v1 = vpop.eup %2969  ;;  %v2253_v60 = vmul.f32 1.442695, %v2229_v3  ;;  %v2364_v21 = vadd.f32 %v2968_v45, %v2363_v24 }
 0x2c5   : > { %v2276_v12 = vadd.f32 1.0, %v2970_v1  ;;  %v2135_v27 = vpop.f32.mrf.mxu3  ;;  %v2972_v10 = vpop.eup %2971 }
 0x2c6   : > { %v2200_v37 = vpop.f32.mrf.mxu0  ;;  %2973 = vpow2.f32 %v2253_v60  ;;  %v2136_v28 = vadd.f32 %v3997_v50, %v2135_v27  ;;  %v2368_v62 = vsel %vm2367_vm9, %v2968_v45, %v2364_v21  ;;  %v2376_v26 = vmul.f32 %v2972_v10, %v2275_v34 }
 0x2c7   : > { %2975 = vrcp.f32 %v2276_v12  ;;  %v2373_v9 = vsel %vm2370_vm10, %v2372_v25, %v2368_v62  ;;  %vm2381_vm11 = vweird.f32 %v2972_v10  ;;  %v2401_v49 = vand.u32 2147483648, %v2276_v12 }
 0x2c8   : > { %v2201_v47 = vadd.f32 %v2200_v37, %v2136_v28  ;;  %2531 = vst.msk [vmem:[%s4008_s28 + $0x28] sm:$0xff] %vm2525_vm4, %v2373_v9  ;;  %v2377_v53 = vsub.f32 1.0, %v2376_v26  ;;  %vm2382_vm13 = vmor %vm2380_vm12, %vm2381_vm11  ;;  %v2399_v36 = vand.u32 2147483647, %v2276_v12  ;;  %vm2395_vm0 = vweird.f32 %v2276_v12 }
 0x2c9   : > { %v2402_v6 = vor.u32 1.1754944e-38, %v2401_v49 }
 0x2ca   : > { %v2230_v55 = vsub.f32 0.0, %v2201_v47  ;;  %v2378_v63 = vmul.f32 %v2972_v10, %v2377_v53  ;;  %vm2400_vm2 = vcmp.eq.f32.partialorder %v2399_v36, 8.507059e+37 }
 0x2cc   : > { %v2974_v22 = vpop.eup %2973  ;;  %v2255_v44 = vmul.f32 1.442695, %v2230_v55  ;;  %v2379_v15 = vadd.f32 %v2972_v10, %v2378_v63 }
 0x2cd   : > { %v2976_v18 = vpop.eup %2975  ;;  %v2277_v51 = vadd.f32 1.0, %v2974_v22  ;;  %v2138_v4 = vpop.f32.mrf.mxu3 }
 0x2ce   : > { %v2203_v14 = vpop.f32.mrf.mxu0  ;;  %v2391_v41 = vmul.f32 %v2976_v18, %v2276_v12  ;;  %2977 = vpow2.f32 %v2255_v44  ;;  %v2383_v61 = vsel %vm2382_vm13, %v2972_v10, %v2379_v15  ;;  %v2139_v30 = vadd.f32 %v3997_v50, %v2138_v4 }
 0x2cf   : > { %2979 = vrcp.f32 %v2277_v51  ;;  %v2388_v32 = vsel %vm2385_vm14, %v2387_v2, %v2383_v61  ;;  %vm2396_vm15 = vweird.f32 %v2976_v18  ;;  %v2416_v8 = vand.u32 2147483648, %v2277_v51 }
 0x2d0   : > { %v2392_v23 = vsub.f32 1.0, %v2391_v41  ;;  %2532 = vst.msk [vmem:[%s4008_s28 + $0x30] sm:$0xff] %vm2525_vm4, %v2388_v32  ;;  %v2204_v5 = vadd.f32 %v2203_v14, %v2139_v30  ;;  %vm2397_vm1 = vmor %vm2395_vm0, %vm2396_vm15  ;;  %v2414_v45 = vand.u32 2147483647, %v2277_v51  ;;  %vm2410_vm5 = vweird.f32 %v2277_v51 }
 0x2d1   : > { %v2417_v17 = vor.u32 1.1754944e-38, %v2416_v8 }
 0x2d2   : > { %v2393_v19 = vmul.f32 %v2976_v18, %v2392_v23  ;;  %v2231_v38 = vsub.f32 0.0, %v2204_v5  ;;  %vm2415_vm7 = vcmp.eq.f32.partialorder %v2414_v45, 8.507059e+37 }
 0x2d4   : > { %v2978_v59 = vpop.eup %2977  ;;  %v2394_v54 = vadd.f32 %v2976_v18, %v2393_v19  ;;  %v2257_v31 = vmul.f32 1.442695, %v2231_v38 }
 0x2d5   : > { %v2980_v11 = vpop.eup %2979  ;;  %v2278_v16 = vadd.f32 1.0, %v2978_v59  ;;  %v2141_v48 = vpop.f32.mrf.mxu3 }
 0x2d6   : > { %v2206_v57 = vpop.f32.mrf.mxu0  ;;  %v2398_v35 = vsel %vm2397_vm1, %v2976_v18, %v2394_v54  ;;  %v2406_v20 = vmul.f32 %v2980_v11, %v2277_v51  ;;  %v2142_v7 = vadd.f32 %v3997_v50, %v2141_v48  ;;  %vm2411_vm3 = vweird.f32 %v2980_v11 }
 0x2d7   : > { %v2403_v39 = vsel %vm2400_vm2, %v2402_v6, %v2398_v35  ;;  %2981 = vrcp.f32 %v2278_v16  ;;  %vm2412_vm6 = vmor %vm2410_vm5, %vm2411_vm3  ;;  %v2431_v37 = vand.u32 2147483648, %v2278_v16  ;;  %v2429_v28 = vand.u32 2147483647, %v2278_v16 }
 0x2d8   : > { %2533 = vst.msk [vmem:[%s4008_s28 + $0x38] sm:$0xff] %vm2525_vm4, %v2403_v39  ;;  %v2407_v29 = vsub.f32 1.0, %v2406_v20  ;;  %2983 = vpow2.f32 %v2257_v31  ;;  %v2207_v56 = vadd.f32 %v2206_v57, %v2142_v7  ;;  %vm2425_vm9 = vweird.f32 %v2278_v16 }
 0x2d9   : > { %v2432_v26 = vor.u32 1.1754944e-38, %v2431_v37  ;;  %vm2430_vm11 = vcmp.eq.f32.partialorder %v2429_v28, 8.507059e+37 }
 0x2da   : > { %v2408_v0 = vmul.f32 %v2980_v11, %v2407_v29  ;;  %v2232_v43 = vsub.f32 0.0, %v2207_v56 }
 0x2dc   : > { %v2409_v34 = vadd.f32 %v2980_v11, %v2408_v0  ;;  %v2259_v24 = vmul.f32 1.442695, %v2232_v43 }
 0x2dd   : > { %v2982_v42 = vpop.eup %2981  ;;  %v2144_v52 = vpop.f32.mrf.mxu3 }
 0x2de   : > { %v2209_v33 = vpop.f32.mrf.mxu0  ;;  %v2984_v3 = vpop.eup %2983  ;;  %v2413_v58 = vsel %vm2412_vm6, %v2980_v11, %v2409_v34  ;;  %v2421_v1 = vmul.f32 %v2982_v42, %v2278_v16  ;;  %v2145_v12 = vadd.f32 %v3997_v50, %v2144_v52  ;;  %2985 = vpow2.f32 %v2259_v24 }
 0x2df   : > { %v2418_v46 = vsel %vm2415_vm7, %v2417_v17, %v2413_v58  ;;  %v2279_v60 = vadd.f32 1.0, %v2984_v3  ;;  %vm2426_vm8 = vweird.f32 %v2982_v42 }
 0x2e0   : > { %2534 = vst.msk [vmem:[%s4008_s28 + $0x40] sm:$0xff] %vm2525_vm4, %v2418_v46  ;;  %v2422_v27 = vsub.f32 1.0, %v2421_v1  ;;  %v2210_v10 = vadd.f32 %v2209_v33, %v2145_v12  ;;  %vm2427_vm10 = vmor %vm2425_vm9, %vm2426_vm8 }
 0x2e1   : > { %2987 = vrcp.f32 %v2279_v60  ;;  %v2446_v15 = vand.u32 2147483648, %v2279_v60  ;;  %v2444_v2 = vand.u32 2147483647, %v2279_v60  ;;  %vm2440_vm13 = vweird.f32 %v2279_v60 }
 0x2e2   : > { %v2423_v21 = vmul.f32 %v2982_v42, %v2422_v27  ;;  %v2233_v62 = vsub.f32 0.0, %v2210_v10 }
 0x2e3   : > { %v2447_v5 = vor.u32 1.1754944e-38, %v2446_v15  ;;  %vm2445_vm15 = vcmp.eq.f32.partialorder %v2444_v2, 8.507059e+37 }
 0x2e4   : > { %v2424_v25 = vadd.f32 %v2982_v42, %v2423_v21  ;;  %v2986_v53 = vpop.eup %2985  ;;  %v2261_v40 = vmul.f32 1.442695, %v2233_v62 }
 0x2e5   : > { %v2147_v47 = vpop.f32.mrf.mxu3  ;;  %v2280_v44 = vadd.f32 1.0, %v2986_v53 }
 0x2e6   : > { %v2212_v9 = vpop.f32.mrf.mxu0  ;;  %v2428_v55 = vsel %vm2427_vm10, %v2982_v42, %v2424_v25  ;;  %v2148_v22 = vadd.f32 %v3997_v50, %v2147_v47  ;;  %2989 = vpow2.f32 %v2261_v40 }
 0x2e7   : > { %v2988_v63 = vpop.eup %2987  ;;  %v2433_v13 = vsel %vm2430_vm11, %v2432_v26, %v2428_v55  ;;  %2991 = vrcp.f32 %v2280_v44  ;;  %v2461_v57 = vand.u32 2147483648, %v2280_v44  ;;  %v2459_v31 = vand.u32 2147483647, %v2280_v44 }
 0x2e8   : > { %2535 = vst.msk [vmem:[%s4008_s28 + $0x48] sm:$0xff] %vm2525_vm4, %v2433_v13  ;;  %v2436_v18 = vmul.f32 %v2988_v63, %v2279_v60  ;;  %v2213_v51 = vadd.f32 %v2212_v9, %v2148_v22  ;;  %vm2441_vm12 = vweird.f32 %v2988_v63  ;;  %vm2455_vm1 = vweird.f32 %v2280_v44 }
 0x2e9   : > { %vm2442_vm14 = vmor %vm2440_vm13, %vm2441_vm12  ;;  %v2462_v56 = vor.u32 1.1754944e-38, %v2461_v57  ;;  %vm2460_vm3 = vcmp.eq.f32.partialorder %v2459_v31, 8.507059e+37 }
 0x2ea   : > { %v2437_v4 = vsub.f32 1.0, %v2436_v18  ;;  %v2234_v14 = vsub.f32 0.0, %v2213_v51 }
 0x2ec   : > { %v2438_v41 = vmul.f32 %v2988_v63, %v2437_v4  ;;  %v2263_v61 = vmul.f32 1.442695, %v2234_v14  ;;  %v2990_v32 = vpop.eup %2989 }
 0x2ed   : > { %v2150_v23 = vpop.f32.mrf.mxu3  ;;  %v2992_v36 = vpop.eup %2991  ;;  %v2281_v59 = vadd.f32 1.0, %v2990_v32 }
 0x2ee   : > { %v2215_v30 = vpop.f32.mrf.mxu0  ;;  %v2439_v49 = vadd.f32 %v2988_v63, %v2438_v41  ;;  %2993 = vpow2.f32 %v2263_v61  ;;  %v2151_v19 = vadd.f32 %v3997_v50, %v2150_v23  ;;  %v2451_v38 = vmul.f32 %v2992_v36, %v2280_v44 }
 0x2ef   : > { %2995 = vrcp.f32 %v2281_v59  ;;  %vm2456_vm0 = vweird.f32 %v2992_v36  ;;  %v2476_v58 = vand.u32 2147483648, %v2281_v59  ;;  %v2474_v46 = vand.u32 2147483647, %v2281_v59 }
 0x2f0   : > { %v2443_v54 = vsel %vm2442_vm14, %v2988_v63, %v2439_v49  ;;  %v2216_v11 = vadd.f32 %v2215_v30, %v2151_v19  ;;  %v2452_v16 = vsub.f32 1.0, %v2451_v38  ;;  %vm2457_vm2 = vmor %vm2455_vm1, %vm2456_vm0  ;;  %vm2470_vm6 = vweird.f32 %v2281_v59 }
 0x2f1   : > { %v2448_v6 = vsel %vm2445_vm15, %v2447_v5, %v2443_v54  ;;  %v2477_v21 = vor.u32 1.1754944e-38, %v2476_v58  ;;  %vm2475_vm8 = vcmp.eq.f32.partialorder %v2474_v46, 8.507059e+37 }
 0x2f2   : > { %2536 = vst.msk [vmem:[%s4008_s28 + $0x50] sm:$0xff] %vm2525_vm4, %v2448_v6  ;;  %v2235_v48 = vsub.f32 0.0, %v2216_v11  ;;  %v2453_v20 = vmul.f32 %v2992_v36, %v2452_v16 }
 0x2f4   : > { %v2994_v35 = vpop.eup %2993  ;;  %v2265_v39 = vmul.f32 1.442695, %v2235_v48  ;;  %v2454_v8 = vadd.f32 %v2992_v36, %v2453_v20 }
 0x2f5   : > { %v2282_v29 = vadd.f32 1.0, %v2994_v35  ;;  %v2153_v7 = vpop.f32.mrf.mxu3  ;;  %v2996_v45 = vpop.eup %2995 }
 0x2f6   : > { %2997 = vpow2.f32 %v2265_v39  ;;  %v2154_v0 = vadd.f32 %v3997_v50, %v2153_v7  ;;  %v2218_v34 = vpop.f32.mrf.mxu0  ;;  %v2458_v43 = vsel %vm2457_vm2, %v2992_v36, %v2454_v8  ;;  %v2466_v42 = vmul.f32 %v2996_v45, %v2281_v59 }
 0x2f7   : > { %2999 = vrcp.f32 %v2282_v29  ;;  %v2463_v52 = vsel %vm2460_vm3, %v2462_v56, %v2458_v43  ;;  %vm2471_vm5 = vweird.f32 %v2996_v45  ;;  %v2491_v62 = vand.u32 2147483648, %v2282_v29 }
 0x2f8   : > { %v2219_v17 = vadd.f32 %v2218_v34, %v2154_v0  ;;  %2537 = vst.msk [vmem:[%s4008_s28 + $0x58] sm:$0xff] %vm2525_vm4, %v2463_v52  ;;  %v2467_v33 = vsub.f32 1.0, %v2466_v42  ;;  %vm2472_vm7 = vmor %vm2470_vm6, %vm2471_vm5  ;;  %v2489_v47 = vand.u32 2147483647, %v2282_v29  ;;  %vm2485_vm10 = vweird.f32 %v2282_v29 }
 0x2f9   : > { %v2492_v40 = vor.u32 1.1754944e-38, %v2491_v62 }
 0x2fa   : > { %v2236_v3 = vsub.f32 0.0, %v2219_v17  ;;  %v2468_v24 = vmul.f32 %v2996_v45, %v2467_v33  ;;  %vm2490_vm12 = vcmp.eq.f32.partialorder %v2489_v47, 8.507059e+37 }
 0x2fc   : > { %v2998_v1 = vpop.eup %2997  ;;  %v2267_v50 = vmul.f32 1.442695, %v2236_v3  ;;  %v2469_v27 = vadd.f32 %v2996_v45, %v2468_v24 }
 0x2fd   : > { %v3000_v60 = vpop.eup %2999  ;;  %v2283_v12 = vadd.f32 1.0, %v2998_v1 }
 0x2fe   : > { %v2481_v37 = vmul.f32 %v3000_v60, %v2282_v29  ;;  %3001 = vpow2.f32 %v2267_v50  ;;  %v2473_v28 = vsel %vm2472_vm7, %v2996_v45, %v2469_v27  ;;  %vm2486_vm9 = vweird.f32 %v3000_v60 }
 0x2ff   : > { %3003 = vrcp.f32 %v2283_v12  ;;  %v2478_v25 = vsel %vm2475_vm8, %v2477_v21, %v2473_v28  ;;  %vm2487_vm11 = vmor %vm2485_vm10, %vm2486_vm9  ;;  %v2506_v51 = vand.u32 2147483648, %v2283_v12  ;;  %v2504_v14 = vand.u32 2147483647, %v2283_v12 }
 0x300   : > { %v2482_v10 = vsub.f32 1.0, %v2481_v37  ;;  %2538 = vst.msk [vmem:[%s4008_s28 + $0x60] sm:$0xff] %vm2525_vm4, %v2478_v25  ;;  %vm2500_vm14 = vweird.f32 %v2283_v12 }
 0x301   : > { %v2507_v2 = vor.u32 1.1754944e-38, %v2506_v51  ;;  %vm2505_vm0 = vcmp.eq.f32.partialorder %v2504_v14, 8.507059e+37 }
 0x302   : > { %v2483_v26 = vmul.f32 %v3000_v60, %v2482_v10 }
 0x304   : > { %v3002_v9 = vpop.eup %3001  ;;  %v2484_v53 = vadd.f32 %v3000_v60, %v2483_v26 }
 0x305   : > { %v3004_v55 = vpop.eup %3003  ;;  %v2284_v22 = vadd.f32 1.0, %v3002_v9 }
 0x306   : > { %v2488_v63 = vsel %vm2487_vm11, %v3000_v60, %v2484_v53  ;;  %v2496_v13 = vmul.f32 %v3004_v55, %v2283_v12  ;;  %vm2501_vm13 = vweird.f32 %v3004_v55 }
 0x307   : > { %v2493_v44 = vsel %vm2490_vm12, %v2492_v40, %v2488_v63  ;;  %3005 = vrcp.f32 %v2284_v22  ;;  %vm2502_vm15 = vmor %vm2500_vm14, %vm2501_vm13  ;;  %v2521_v49 = vand.u32 2147483648, %v2284_v22  ;;  %v2519_v36 = vand.u32 2147483647, %v2284_v22 }
 0x308   : > { %2539 = vst.msk [vmem:[%s4008_s28 + $0x68] sm:$0xff] %vm2525_vm4, %v2493_v44  ;;  %v2497_v18 = vsub.f32 1.0, %v2496_v13  ;;  %vm2515_vm2 = vweird.f32 %v2284_v22 }
 0x309   : > { %v2522_v59 = vor.u32 1.1754944e-38, %v2521_v49  ;;  %vm2520_vm5 = vcmp.eq.f32.partialorder %v2519_v36, 8.507059e+37 }
 0x30a   : > { %v2498_v4 = vmul.f32 %v3004_v55, %v2497_v18 }
 0x30c   : > { %v2499_v15 = vadd.f32 %v3004_v55, %v2498_v4 }
 0x30d   : > { %v3006_v41 = vpop.eup %3005 }
 0x30e   : > { %v2503_v61 = vsel %vm2502_vm15, %v3004_v55, %v2499_v15  ;;  %v2511_v23 = vmul.f32 %v3006_v41, %v2284_v22  ;;  %vm2516_vm1 = vweird.f32 %v3006_v41 }
 0x30f   : > { %v2508_v30 = vsel %vm2505_vm0, %v2507_v2, %v2503_v61  ;;  %vm2517_vm3 = vmor %vm2515_vm2, %vm2516_vm1 }
 0x310   : > { %2540 = vst.msk [vmem:[%s4008_s28 + $0x70] sm:$0xff] %vm2525_vm4, %v2508_v30  ;;  %v2512_v32 = vsub.f32 1.0, %v2511_v23 }
 0x312   : > { %v2513_v19 = vmul.f32 %v3006_v41, %v2512_v32 }
 0x314   : > { %v2514_v5 = vadd.f32 %v3006_v41, %v2513_v19 }
 0x316   : > { %v2518_v54 = vsel %vm2517_vm3, %v3006_v41, %v2514_v5 }
 0x317   : > { %v2523_v38 = vsel %vm2520_vm5, %v2522_v59, %v2518_v54 }
 0x318   : > { %2541 = vst.msk [vmem:[%s4008_s28 + $0x78] sm:$0xff] %vm2525_vm4, %v2523_v38 }
 0x319 PF: > { %s22_s13 = sadd.s32 1, %s3179_s13   ;;  %s4099_s30 = smov %s3171_s11 }
 0x31a   : > { %p19_p1 = scmp.ge.s32.totalorder %s22_s13, 6   ;;  %s4100_s10 = smov %s3175_s12 }
 0x31b   : > { %s4101_s11 = smov %s4104_s23  ;;  %s4102_s12 = smov %s4108_s24 }
 0x31c   :  { %21 = sbr.rel (!%p19_p1) target bundleno = 9 (0x9), region = 112 }
 0x321   :  { %2574 = vsyncpa [#allocation5], 1 }
 0x322   :  { %2576 = vsyncpa [#allocation5 + $0x1], 1 }
 0x323   :  { %2577 = vsyncpa [#allocation7], 1 }
 0x324   :  { %2578 = vsyncpa [#allocation10], 1 }

</bundles_post_ra>
